<compile_context>
chip_gen: v7x
topology: tpu7x:2x2x1
jax: 0.10.0
libtpu: 0.0.40
codegen_flags: <defaults>
</compile_context>

<pallas_src>
import functools

import jax
import jax.numpy as jnp
from jax.experimental import pallas as pl
from jax.experimental.pallas import tpu as pltpu


def _round_up(x, m):
    return ((x + m - 1) // m) * m


# ---------------------------------------------------------------------------
# Pallas kernel: tiled matmul (bf16 operands, f32 accumulate) + bias
# ---------------------------------------------------------------------------
def _matmul_bias_kernel(a_ref, w_ref, b_ref, o_ref, acc_ref):
    @pl.when(pl.program_id(2) == 0)
    def _():
        acc_ref[...] = jnp.zeros_like(acc_ref)

    acc_ref[...] += jnp.dot(a_ref[...], w_ref[...],
                            preferred_element_type=jnp.float32)

    @pl.when(pl.program_id(2) == pl.num_programs(2) - 1)
    def _():
        o_ref[...] = (acc_ref[...] + b_ref[...]).astype(o_ref.dtype)


def pallas_matmul_bias(a_bf16, w_pad, b_pad, out_dtype):
    """a_bf16: [M, K] bf16 (unpadded ok); w_pad: [Kp, Np] bf16 (pre-padded);
    b_pad: [1, Np] f32 (pre-padded).  Returns padded [Mp, Np] in out_dtype."""
    M, K = a_bf16.shape
    Kp, Np = w_pad.shape

    # Few, fat grid steps: full-K / full-N blocks (all layers have Kp<=512, Np=128).
    tm = 256 if M >= 256 else _round_up(max(M, 1), 128)
    tk = Kp if Kp <= 512 else 512
    tn = Np if Np <= 512 else 512
    assert Kp % tk == 0 and Np % tn == 0
    Mp = _round_up(M, tm)

    a_p = a_bf16
    if (Mp, Kp) != (M, K):
        a_p = jnp.pad(a_bf16, ((0, Mp - M), (0, Kp - K)))

    return pl.pallas_call(
        _matmul_bias_kernel,
        out_shape=jax.ShapeDtypeStruct((Mp, Np), out_dtype),
        grid_spec=pltpu.PrefetchScalarGridSpec(
            num_scalar_prefetch=0,
            grid=(Mp // tm, Np // tn, Kp // tk),
            in_specs=[
                pl.BlockSpec((tm, tk), lambda i, j, k: (i, k)),
                pl.BlockSpec((tk, tn), lambda i, j, k: (k, j)),
                pl.BlockSpec((1, tn), lambda i, j, k: (0, j)),
            ],
            out_specs=pl.BlockSpec((tm, tn), lambda i, j, k: (i, j)),
            scratch_shapes=[pltpu.VMEM((tm, tn), jnp.float32)],
        ),
        compiler_params=pltpu.CompilerParams(
            dimension_semantics=("parallel", "parallel", "arbitrary")),
    )(a_p, w_pad, b_pad)


# ---------------------------------------------------------------------------
# Conv2d(k=3, stride=2, padding=1) via stride-2 im2col + Pallas matmul
# ---------------------------------------------------------------------------
def conv2d_s2(x_nhwc, w_pad, b_pad, cout, out_dtype):
    """x_nhwc: [B, H, W, Cin] bf16; w_pad: [Kp, Np] bf16 whose valid rows are
    ordered (kh, kw, ci).  Returns [B, ceil(H/2), ceil(W/2), cout]."""
    B, H, W, Cin = x_nhwc.shape
    Ho, Wo = (H + 1) // 2, (W + 1) // 2
    xp = jnp.pad(x_nhwc, ((0, 0), (1, 1), (1, 1), (0, 0)))
    cols = []
    for kh in range(3):
        for kw in range(3):
            # patch(oh, ow, kh, kw) = xp[:, 2*oh + kh, 2*ow + kw, :]
            cols.append(xp[:, kh:kh + 2 * Ho:2, kw:kw + 2 * Wo:2, :])
    patches = jnp.concatenate(cols, axis=-1)                 # [B, Ho, Wo, 9*Cin]
    M = B * Ho * Wo
    out = pallas_matmul_bias(patches.reshape(M, 9 * Cin), w_pad, b_pad, out_dtype)
    return out[:M, :cout].reshape(B, Ho, Wo, cout)


# ---------------------------------------------------------------------------
# Parameters (PyTorch layouts) + one-time preprocessing
# ---------------------------------------------------------------------------
_CHANS = ((3, 16), (16, 32), (32, 32), (32, 32))
_COUTS = tuple(c for _, c in _CHANS)


def init_params(key):
    def nrm(k, shape, scale=0.05):
        return scale * jax.random.normal(k, shape, jnp.float32)

    ks = jax.random.split(key, 10)
    params = {}
    for i, (cin, cout) in enumerate(_CHANS, start=1):
        params[f"conv{i}_w"] = nrm(ks[2 * (i - 1)], (cout, cin, 3, 3))  # torch Conv2d
        params[f"conv{i}_b"] = nrm(ks[2 * (i - 1) + 1], (cout,))
    params["fc1_w"] = nrm(ks[8], (1, 32 * 4 * 4))                       # torch Linear [out, in]
    params["fc1_b"] = nrm(ks[9], (1,))
    return params


def prepare_params(params):
    """Hoisted weight prep: flatten to matmul layout, pad to lane/sublane tiles,
    cast matmul operands to bf16 (bias stays f32).  Run once, reuse per forward."""
    def pad_w(w2d):
        K, N = w2d.shape
        Kp, Np = _round_up(K, 128), _round_up(N, 128)
        return jnp.pad(w2d.astype(jnp.bfloat16), ((0, Kp - K), (0, Np - N)))

    def pad_b(b):
        Np = _round_up(b.shape[0], 128)
        return jnp.pad(b.astype(jnp.float32), (0, Np - b.shape[0])).reshape(1, Np)

    prepped = {}
    for i, (cin, cout) in enumerate(_CHANS, start=1):
        w = params[f"conv{i}_w"]                                  # [Cout, Cin, 3, 3]
        w2d = jnp.transpose(w, (2, 3, 1, 0)).reshape(9 * cin, cout)  # [(kh,kw,ci), co]
        prepped[f"conv{i}_w"] = pad_w(w2d)
        prepped[f"conv{i}_b"] = pad_b(params[f"conv{i}_b"])
    prepped["fc1_w"] = pad_w(params["fc1_w"].T)                   # [512, 1] -> [512, 128]
    prepped["fc1_b"] = pad_b(params["fc1_b"])
    return prepped


# ---------------------------------------------------------------------------
# Discriminator forward
# ---------------------------------------------------------------------------
@jax.jit
def discriminator_forward(prepped, x_nchw):
    """x_nchw: [B, 3, 64, 64] f32 -> [B, 1] f32 (matches PyTorch Discriminator)."""
    B = x_nchw.shape[0]
    h = jnp.transpose(x_nchw, (0, 2, 3, 1)).astype(jnp.bfloat16)  # NHWC bf16
    for i, cout in enumerate(_COUTS, start=1):
        # Spec's Sequential has no activation functions, so none are applied.
        h = conv2d_s2(h, prepped[f"conv{i}_w"], prepped[f"conv{i}_b"],
                      cout, jnp.bfloat16)
    # Flatten must match torch .view on NCHW: (C, H, W) order.
    flat = jnp.transpose(h, (0, 3, 1, 2)).reshape(B, -1)          # [B, 512]
    out = pallas_matmul_bias(flat, prepped["fc1_w"], prepped["fc1_b"], jnp.float32)
    return out[:B, :1]


if __name__ == "__main__":
    key = jax.random.PRNGKey(0)
    pkey, xkey = jax.random.split(key)
    params = init_params(pkey)
    prepped = prepare_params(params)

    B = 2
    x = jax.random.normal(xkey, (B, 3, 64, 64), jnp.float32)

    out = discriminator_forward(prepped, x)
    out = jax.block_until_ready(out)
    assert out.shape == (B, 1), out.shape
    assert jnp.all(jnp.isfinite(out))
    print("KERNEL_OK")
</pallas_src>

<mosaic_0001>
module attributes {stable_mosaic.version = 11 : i64} {
  func.func @_matmul_bias_kernel(%arg0: i32, %arg1: i32, %arg2: i32, %arg3: memref<256x128xbf16, #tpu.memory_space<vmem>>, %arg4: memref<128x128xbf16, #tpu.memory_space<vmem>>, %arg5: memref<1x128xf32, #tpu.memory_space<vmem>>, %arg6: memref<256x128xbf16, #tpu.memory_space<vmem>>, %arg7: memref<256x128xf32, #tpu.memory_space<vmem>>) attributes {dimension_semantics = [#tpu.dimension_semantics<parallel>, #tpu.dimension_semantics<parallel>, #tpu.dimension_semantics<arbitrary>], iteration_bounds = array<i64: 8, 1, 1>, scalar_prefetch = 0 : i64, scratch_operands = 1 : i64, tpu.core_type = #tpu.core_type<tc>, window_params = [{transform_indices = @transform_0, window_bounds = array<i64: 256, 128>}, {transform_indices = @transform_1, window_bounds = array<i64: 128, 128>}, {transform_indices = @transform_2, window_bounds = array<i64: 1, 128>}, {transform_indices = @transform_3, window_bounds = array<i64: 256, 128>}]} {
    %c0_i32 = arith.constant 0 : i32
    %0 = arith.cmpi eq, %arg2, %c0_i32 : i32
    %1 = arith.extui %0 : i1 to i32
    %c0_i32_0 = arith.constant 0 : i32
    %2 = arith.cmpi ne, %1, %c0_i32_0 : i32
    scf.if %2 {
      %cst_10 = arith.constant 0.000000e+00 : f32
      %12 = vector.broadcast %cst_10 : f32 to vector<256x128xf32>
      %c0_11 = arith.constant 0 : index
      %c0_12 = arith.constant 0 : index
      %13 = vector.load %arg7[%c0_11, %c0_12] : memref<256x128xf32, #tpu.memory_space<vmem>>, vector<256x128xf32>
      tpu.vector_store %arg7[%c0_11, %c0_12], %12 {strides = array<i32>} : memref<256x128xf32, #tpu.memory_space<vmem>>, vector<256x128xf32>,
    } else {
    }
    %c0 = arith.constant 0 : index
    %c0_1 = arith.constant 0 : index
    %3 = vector.load %arg7[%c0, %c0_1] : memref<256x128xf32, #tpu.memory_space<vmem>>, vector<256x128xf32>
    %c0_2 = arith.constant 0 : index
    %c0_3 = arith.constant 0 : index
    %4 = vector.load %arg3[%c0_2, %c0_3] : memref<256x128xbf16, #tpu.memory_space<vmem>>, vector<256x128xbf16>
    %c0_4 = arith.constant 0 : index
    %c0_5 = arith.constant 0 : index
    %5 = vector.load %arg4[%c0_4, %c0_5] : memref<128x128xbf16, #tpu.memory_space<vmem>>, vector<128x128xbf16>
    %cst = arith.constant dense<0.000000e+00> : vector<256x128xf32>
    %6 = tpu.matmul %4, %5, %cst {dimension_numbers = #tpu.dot_dimension_numbers<[1], [0], [0], [1], [0, 0, 1, 1], [], []>} : vector<256x128xbf16>, vector<128x128xbf16>, vector<256x128xf32> -> vector<256x128xf32>
    %7 = arith.addf %3, %6 : vector<256x128xf32>
    %c0_6 = arith.constant 0 : index
    %c0_7 = arith.constant 0 : index
    %8 = vector.load %arg7[%c0_6, %c0_7] : memref<256x128xf32, #tpu.memory_space<vmem>>, vector<256x128xf32>
    tpu.vector_store %arg7[%c0_6, %c0_7], %7 {strides = array<i32>} : memref<256x128xf32, #tpu.memory_space<vmem>>, vector<256x128xf32>,
    %c0_i32_8 = arith.constant 0 : i32
    %9 = arith.cmpi eq, %arg2, %c0_i32_8 : i32
    %10 = arith.extui %9 : i1 to i32
    %c0_i32_9 = arith.constant 0 : i32
    %11 = arith.cmpi ne, %10, %c0_i32_9 : i32
    scf.if %11 {
      %c0_10 = arith.constant 0 : index
      %c0_11 = arith.constant 0 : index
      %12 = vector.load %arg7[%c0_10, %c0_11] : memref<256x128xf32, #tpu.memory_space<vmem>>, vector<256x128xf32>
      %c0_12 = arith.constant 0 : index
      %c0_13 = arith.constant 0 : index
      %13 = vector.load %arg5[%c0_12, %c0_13] : memref<1x128xf32, #tpu.memory_space<vmem>>, vector<1x128xf32>
      %14 = vector.broadcast %13 : vector<1x128xf32> to vector<256x128xf32>
      %15 = arith.addf %12, %14 : vector<256x128xf32>
      %16 = arith.truncf %15 : vector<256x128xf32> to vector<256x128xbf16>
      %c0_14 = arith.constant 0 : index
      %c0_15 = arith.constant 0 : index
      %17 = vector.load %arg6[%c0_14, %c0_15] : memref<256x128xbf16, #tpu.memory_space<vmem>>, vector<256x128xbf16>
      tpu.vector_store %arg6[%c0_14, %c0_15], %16 {strides = array<i32>} : memref<256x128xbf16, #tpu.memory_space<vmem>>, vector<256x128xbf16>,
    } else {
    }
    return
  }
  func.func @transform_0(%arg0: i32, %arg1: i32, %arg2: i32) -> (i32, i32) {
    %c0_i32 = arith.constant 0 : i32
    return %arg0, %arg2 : i32, i32
  }
  func.func @transform_1(%arg0: i32, %arg1: i32, %arg2: i32) -> (i32, i32) {
    %c0_i32 = arith.constant 0 : i32
    return %arg2, %arg1 : i32, i32
  }
  func.func @transform_2(%arg0: i32, %arg1: i32, %arg2: i32) -> (i32, i32) {
    %c0_i32 = arith.constant 0 : i32
    %c0_i32_0 = arith.constant 0 : i32
    return %c0_i32, %arg1 : i32, i32
  }
  func.func @transform_3(%arg0: i32, %arg1: i32, %arg2: i32) -> (i32, i32) {
    %c0_i32 = arith.constant 0 : i32
    return %arg0, %arg1 : i32, i32
  }
}

module attributes {stable_mosaic.version = 11 : i64} {
  func.func @_matmul_bias_kernel(%arg0: i32, %arg1: i32, %arg2: i32, %arg3: memref<256x256xbf16, #tpu.memory_space<vmem>>, %arg4: memref<256x128xbf16, #tpu.memory_space<vmem>>, %arg5: memref<1x128xf32, #tpu.memory_space<vmem>>, %arg6: memref<256x128xbf16, #tpu.memory_space<vmem>>, %arg7: memref<256x128xf32, #tpu.memory_space<vmem>>) attributes {dimension_semantics = [#tpu.dimension_semantics<parallel>, #tpu.dimension_semantics<parallel>, #tpu.dimension_semantics<arbitrary>], iteration_bounds = array<i64: 2, 1, 1>, scalar_prefetch = 0 : i64, scratch_operands = 1 : i64, tpu.core_type = #tpu.core_type<tc>, window_params = [{transform_indices = @transform_0, window_bounds = array<i64: 256, 256>}, {transform_indices = @transform_1, window_bounds = array<i64: 256, 128>}, {transform_indices = @transform_2, window_bounds = array<i64: 1, 128>}, {transform_indices = @transform_3, window_bounds = array<i64: 256, 128>}]} {
    %c0_i32 = arith.constant 0 : i32
    %0 = arith.cmpi eq, %arg2, %c0_i32 : i32
    %1 = arith.extui %0 : i1 to i32
    %c0_i32_0 = arith.constant 0 : i32
    %2 = arith.cmpi ne, %1, %c0_i32_0 : i32
    scf.if %2 {
      %cst_10 = arith.constant 0.000000e+00 : f32
      %12 = vector.broadcast %cst_10 : f32 to vector<256x128xf32>
      %c0_11 = arith.constant 0 : index
      %c0_12 = arith.constant 0 : index
      %13 = vector.load %arg7[%c0_11, %c0_12] : memref<256x128xf32, #tpu.memory_space<vmem>>, vector<256x128xf32>
      tpu.vector_store %arg7[%c0_11, %c0_12], %12 {strides = array<i32>} : memref<256x128xf32, #tpu.memory_space<vmem>>, vector<256x128xf32>,
    } else {
    }
    %c0 = arith.constant 0 : index
    %c0_1 = arith.constant 0 : index
    %3 = vector.load %arg7[%c0, %c0_1] : memref<256x128xf32, #tpu.memory_space<vmem>>, vector<256x128xf32>
    %c0_2 = arith.constant 0 : index
    %c0_3 = arith.constant 0 : index
    %4 = vector.load %arg3[%c0_2, %c0_3] : memref<256x256xbf16, #tpu.memory_space<vmem>>, vector<256x256xbf16>
    %c0_4 = arith.constant 0 : index
    %c0_5 = arith.constant 0 : index
    %5 = vector.load %arg4[%c0_4, %c0_5] : memref<256x128xbf16, #tpu.memory_space<vmem>>, vector<256x128xbf16>
    %cst = arith.constant dense<0.000000e+00> : vector<256x128xf32>
    %6 = tpu.matmul %4, %5, %cst {dimension_numbers = #tpu.dot_dimension_numbers<[1], [0], [0], [1], [0, 0, 1, 1], [], []>} : vector<256x256xbf16>, vector<256x128xbf16>, vector<256x128xf32> -> vector<256x128xf32>
    %7 = arith.addf %3, %6 : vector<256x128xf32>
    %c0_6 = arith.constant 0 : index
    %c0_7 = arith.constant 0 : index
    %8 = vector.load %arg7[%c0_6, %c0_7] : memref<256x128xf32, #tpu.memory_space<vmem>>, vector<256x128xf32>
    tpu.vector_store %arg7[%c0_6, %c0_7], %7 {strides = array<i32>} : memref<256x128xf32, #tpu.memory_space<vmem>>, vector<256x128xf32>,
    %c0_i32_8 = arith.constant 0 : i32
    %9 = arith.cmpi eq, %arg2, %c0_i32_8 : i32
    %10 = arith.extui %9 : i1 to i32
    %c0_i32_9 = arith.constant 0 : i32
    %11 = arith.cmpi ne, %10, %c0_i32_9 : i32
    scf.if %11 {
      %c0_10 = arith.constant 0 : index
      %c0_11 = arith.constant 0 : index
      %12 = vector.load %arg7[%c0_10, %c0_11] : memref<256x128xf32, #tpu.memory_space<vmem>>, vector<256x128xf32>
      %c0_12 = arith.constant 0 : index
      %c0_13 = arith.constant 0 : index
      %13 = vector.load %arg5[%c0_12, %c0_13] : memref<1x128xf32, #tpu.memory_space<vmem>>, vector<1x128xf32>
      %14 = vector.broadcast %13 : vector<1x128xf32> to vector<256x128xf32>
      %15 = arith.addf %12, %14 : vector<256x128xf32>
      %16 = arith.truncf %15 : vector<256x128xf32> to vector<256x128xbf16>
      %c0_14 = arith.constant 0 : index
      %c0_15 = arith.constant 0 : index
      %17 = vector.load %arg6[%c0_14, %c0_15] : memref<256x128xbf16, #tpu.memory_space<vmem>>, vector<256x128xbf16>
      tpu.vector_store %arg6[%c0_14, %c0_15], %16 {strides = array<i32>} : memref<256x128xbf16, #tpu.memory_space<vmem>>, vector<256x128xbf16>,
    } else {
    }
    return
  }
  func.func @transform_0(%arg0: i32, %arg1: i32, %arg2: i32) -> (i32, i32) {
    %c0_i32 = arith.constant 0 : i32
    return %arg0, %arg2 : i32, i32
  }
  func.func @transform_1(%arg0: i32, %arg1: i32, %arg2: i32) -> (i32, i32) {
    %c0_i32 = arith.constant 0 : i32
    return %arg2, %arg1 : i32, i32
  }
  func.func @transform_2(%arg0: i32, %arg1: i32, %arg2: i32) -> (i32, i32) {
    %c0_i32 = arith.constant 0 : i32
    %c0_i32_0 = arith.constant 0 : i32
    return %c0_i32, %arg1 : i32, i32
  }
  func.func @transform_3(%arg0: i32, %arg1: i32, %arg2: i32) -> (i32, i32) {
    %c0_i32 = arith.constant 0 : i32
    return %arg0, %arg1 : i32, i32
  }
}

module attributes {stable_mosaic.version = 11 : i64} {
  func.func @_matmul_bias_kernel(%arg0: i32, %arg1: i32, %arg2: i32, %arg3: memref<128x384xbf16, #tpu.memory_space<vmem>>, %arg4: memref<384x128xbf16, #tpu.memory_space<vmem>>, %arg5: memref<1x128xf32, #tpu.memory_space<vmem>>, %arg6: memref<128x128xbf16, #tpu.memory_space<vmem>>, %arg7: memref<128x128xf32, #tpu.memory_space<vmem>>) attributes {dimension_semantics = [#tpu.dimension_semantics<parallel>, #tpu.dimension_semantics<parallel>, #tpu.dimension_semantics<arbitrary>], iteration_bounds = array<i64: 1, 1, 1>, scalar_prefetch = 0 : i64, scratch_operands = 1 : i64, tpu.core_type = #tpu.core_type<tc>, window_params = [{transform_indices = @transform_0, window_bounds = array<i64: 128, 384>}, {transform_indices = @transform_1, window_bounds = array<i64: 384, 128>}, {transform_indices = @transform_2, window_bounds = array<i64: 1, 128>}, {transform_indices = @transform_3, window_bounds = array<i64: 128, 128>}]} {
    %c0_i32 = arith.constant 0 : i32
    %0 = arith.cmpi eq, %arg2, %c0_i32 : i32
    %1 = arith.extui %0 : i1 to i32
    %c0_i32_0 = arith.constant 0 : i32
    %2 = arith.cmpi ne, %1, %c0_i32_0 : i32
    scf.if %2 {
      %cst_10 = arith.constant 0.000000e+00 : f32
      %12 = vector.broadcast %cst_10 : f32 to vector<128x128xf32>
      %c0_11 = arith.constant 0 : index
      %c0_12 = arith.constant 0 : index
      %13 = vector.load %arg7[%c0_11, %c0_12] : memref<128x128xf32, #tpu.memory_space<vmem>>, vector<128x128xf32>
      tpu.vector_store %arg7[%c0_11, %c0_12], %12 {strides = array<i32>} : memref<128x128xf32, #tpu.memory_space<vmem>>, vector<128x128xf32>,
    } else {
    }
    %c0 = arith.constant 0 : index
    %c0_1 = arith.constant 0 : index
    %3 = vector.load %arg7[%c0, %c0_1] : memref<128x128xf32, #tpu.memory_space<vmem>>, vector<128x128xf32>
    %c0_2 = arith.constant 0 : index
    %c0_3 = arith.constant 0 : index
    %4 = vector.load %arg3[%c0_2, %c0_3] : memref<128x384xbf16, #tpu.memory_space<vmem>>, vector<128x384xbf16>
    %c0_4 = arith.constant 0 : index
    %c0_5 = arith.constant 0 : index
    %5 = vector.load %arg4[%c0_4, %c0_5] : memref<384x128xbf16, #tpu.memory_space<vmem>>, vector<384x128xbf16>
    %cst = arith.constant dense<0.000000e+00> : vector<128x128xf32>
    %6 = tpu.matmul %4, %5, %cst {dimension_numbers = #tpu.dot_dimension_numbers<[1], [0], [0], [1], [0, 0, 1, 1], [], []>} : vector<128x384xbf16>, vector<384x128xbf16>, vector<128x128xf32> -> vector<128x128xf32>
    %7 = arith.addf %3, %6 : vector<128x128xf32>
    %c0_6 = arith.constant 0 : index
    %c0_7 = arith.constant 0 : index
    %8 = vector.load %arg7[%c0_6, %c0_7] : memref<128x128xf32, #tpu.memory_space<vmem>>, vector<128x128xf32>
    tpu.vector_store %arg7[%c0_6, %c0_7], %7 {strides = array<i32>} : memref<128x128xf32, #tpu.memory_space<vmem>>, vector<128x128xf32>,
    %c0_i32_8 = arith.constant 0 : i32
    %9 = arith.cmpi eq, %arg2, %c0_i32_8 : i32
    %10 = arith.extui %9 : i1 to i32
    %c0_i32_9 = arith.constant 0 : i32
    %11 = arith.cmpi ne, %10, %c0_i32_9 : i32
    scf.if %11 {
      %c0_10 = arith.constant 0 : index
      %c0_11 = arith.constant 0 : index
      %12 = vector.load %arg7[%c0_10, %c0_11] : memref<128x128xf32, #tpu.memory_space<vmem>>, vector<128x128xf32>
      %c0_12 = arith.constant 0 : index
      %c0_13 = arith.constant 0 : index
      %13 = vector.load %arg5[%c0_12, %c0_13] : memref<1x128xf32, #tpu.memory_space<vmem>>, vector<1x128xf32>
      %14 = vector.broadcast %13 : vector<1x128xf32> to vector<128x128xf32>
      %15 = arith.addf %12, %14 : vector<128x128xf32>
      %16 = arith.truncf %15 : vector<128x128xf32> to vector<128x128xbf16>
      %c0_14 = arith.constant 0 : index
      %c0_15 = arith.constant 0 : index
      %17 = vector.load %arg6[%c0_14, %c0_15] : memref<128x128xbf16, #tpu.memory_space<vmem>>, vector<128x128xbf16>
      tpu.vector_store %arg6[%c0_14, %c0_15], %16 {strides = array<i32>} : memref<128x128xbf16, #tpu.memory_space<vmem>>, vector<128x128xbf16>,
    } else {
    }
    return
  }
  func.func @transform_0(%arg0: i32, %arg1: i32, %arg2: i32) -> (i32, i32) {
    %c0_i32 = arith.constant 0 : i32
    return %arg0, %arg2 : i32, i32
  }
  func.func @transform_1(%arg0: i32, %arg1: i32, %arg2: i32) -> (i32, i32) {
    %c0_i32 = arith.constant 0 : i32
    return %arg2, %arg1 : i32, i32
  }
  func.func @transform_2(%arg0: i32, %arg1: i32, %arg2: i32) -> (i32, i32) {
    %c0_i32 = arith.constant 0 : i32
    %c0_i32_0 = arith.constant 0 : i32
    return %c0_i32, %arg1 : i32, i32
  }
  func.func @transform_3(%arg0: i32, %arg1: i32, %arg2: i32) -> (i32, i32) {
    %c0_i32 = arith.constant 0 : i32
    return %arg0, %arg1 : i32, i32
  }
}

module attributes {stable_mosaic.version = 11 : i64} {
  func.func @_matmul_bias_kernel(%arg0: i32, %arg1: i32, %arg2: i32, %arg3: memref<128x512xbf16, #tpu.memory_space<vmem>>, %arg4: memref<512x128xbf16, #tpu.memory_space<vmem>>, %arg5: memref<1x128xf32, #tpu.memory_space<vmem>>, %arg6: memref<128x128xf32, #tpu.memory_space<vmem>>, %arg7: memref<128x128xf32, #tpu.memory_space<vmem>>) attributes {dimension_semantics = [#tpu.dimension_semantics<parallel>, #tpu.dimension_semantics<parallel>, #tpu.dimension_semantics<arbitrary>], iteration_bounds = array<i64: 1, 1, 1>, scalar_prefetch = 0 : i64, scratch_operands = 1 : i64, tpu.core_type = #tpu.core_type<tc>, window_params = [{transform_indices = @transform_0, window_bounds = array<i64: 128, 512>}, {transform_indices = @transform_1, window_bounds = array<i64: 512, 128>}, {transform_indices = @transform_2, window_bounds = array<i64: 1, 128>}, {transform_indices = @transform_3, window_bounds = array<i64: 128, 128>}]} {
    %c0_i32 = arith.constant 0 : i32
    %0 = arith.cmpi eq, %arg2, %c0_i32 : i32
    %1 = arith.extui %0 : i1 to i32
    %c0_i32_0 = arith.constant 0 : i32
    %2 = arith.cmpi ne, %1, %c0_i32_0 : i32
    scf.if %2 {
      %cst_10 = arith.constant 0.000000e+00 : f32
      %12 = vector.broadcast %cst_10 : f32 to vector<128x128xf32>
      %c0_11 = arith.constant 0 : index
      %c0_12 = arith.constant 0 : index
      %13 = vector.load %arg7[%c0_11, %c0_12] : memref<128x128xf32, #tpu.memory_space<vmem>>, vector<128x128xf32>
      tpu.vector_store %arg7[%c0_11, %c0_12], %12 {strides = array<i32>} : memref<128x128xf32, #tpu.memory_space<vmem>>, vector<128x128xf32>,
    } else {
    }
    %c0 = arith.constant 0 : index
    %c0_1 = arith.constant 0 : index
    %3 = vector.load %arg7[%c0, %c0_1] : memref<128x128xf32, #tpu.memory_space<vmem>>, vector<128x128xf32>
    %c0_2 = arith.constant 0 : index
    %c0_3 = arith.constant 0 : index
    %4 = vector.load %arg3[%c0_2, %c0_3] : memref<128x512xbf16, #tpu.memory_space<vmem>>, vector<128x512xbf16>
    %c0_4 = arith.constant 0 : index
    %c0_5 = arith.constant 0 : index
    %5 = vector.load %arg4[%c0_4, %c0_5] : memref<512x128xbf16, #tpu.memory_space<vmem>>, vector<512x128xbf16>
    %cst = arith.constant dense<0.000000e+00> : vector<128x128xf32>
    %6 = tpu.matmul %4, %5, %cst {dimension_numbers = #tpu.dot_dimension_numbers<[1], [0], [0], [1], [0, 0, 1, 1], [], []>} : vector<128x512xbf16>, vector<512x128xbf16>, vector<128x128xf32> -> vector<128x128xf32>
    %7 = arith.addf %3, %6 : vector<128x128xf32>
    %c0_6 = arith.constant 0 : index
    %c0_7 = arith.constant 0 : index
    %8 = vector.load %arg7[%c0_6, %c0_7] : memref<128x128xf32, #tpu.memory_space<vmem>>, vector<128x128xf32>
    tpu.vector_store %arg7[%c0_6, %c0_7], %7 {strides = array<i32>} : memref<128x128xf32, #tpu.memory_space<vmem>>, vector<128x128xf32>,
    %c0_i32_8 = arith.constant 0 : i32
    %9 = arith.cmpi eq, %arg2, %c0_i32_8 : i32
    %10 = arith.extui %9 : i1 to i32
    %c0_i32_9 = arith.constant 0 : i32
    %11 = arith.cmpi ne, %10, %c0_i32_9 : i32
    scf.if %11 {
      %c0_10 = arith.constant 0 : index
      %c0_11 = arith.constant 0 : index
      %12 = vector.load %arg7[%c0_10, %c0_11] : memref<128x128xf32, #tpu.memory_space<vmem>>, vector<128x128xf32>
      %c0_12 = arith.constant 0 : index
      %c0_13 = arith.constant 0 : index
      %13 = vector.load %arg5[%c0_12, %c0_13] : memref<1x128xf32, #tpu.memory_space<vmem>>, vector<1x128xf32>
      %14 = vector.broadcast %13 : vector<1x128xf32> to vector<128x128xf32>
      %15 = arith.addf %12, %14 : vector<128x128xf32>
      %c0_14 = arith.constant 0 : index
      %c0_15 = arith.constant 0 : index
      %16 = vector.load %arg6[%c0_14, %c0_15] : memref<128x128xf32, #tpu.memory_space<vmem>>, vector<128x128xf32>
      tpu.vector_store %arg6[%c0_14, %c0_15], %15 {strides = array<i32>} : memref<128x128xf32, #tpu.memory_space<vmem>>, vector<128x128xf32>,
    } else {
    }
    return
  }
  func.func @transform_0(%arg0: i32, %arg1: i32, %arg2: i32) -> (i32, i32) {
    %c0_i32 = arith.constant 0 : i32
    return %arg0, %arg2 : i32, i32
  }
  func.func @transform_1(%arg0: i32, %arg1: i32, %arg2: i32) -> (i32, i32) {
    %c0_i32 = arith.constant 0 : i32
    return %arg2, %arg1 : i32, i32
  }
  func.func @transform_2(%arg0: i32, %arg1: i32, %arg2: i32) -> (i32, i32) {
    %c0_i32 = arith.constant 0 : i32
    %c0_i32_0 = arith.constant 0 : i32
    return %c0_i32, %arg1 : i32, i32
  }
  func.func @transform_3(%arg0: i32, %arg1: i32, %arg2: i32) -> (i32, i32) {
    %c0_i32 = arith.constant 0 : i32
    return %arg0, %arg1 : i32, i32
  }
}

</mosaic_0001>

<bundles_post_ra>
// kernel: discriminator_forward.5
= control target key start
LH: loop header
LB: loop body
LE: loop exit
PB: predicated region body
PF: predicated region fallthrough
CT: control target
= control target key end

     0   :  { %s1467_s12 = smov 0   ;;  %s1469_s13 = smov 0   ;;  %s1604_s0 = inlined_call_operand.vmem [shape: bf16[2048,128], index: 0, kind: input, shape index: {}]   ;;  %s1605_s1 = inlined_call_operand.vmem [shape: bf16[128,128], index: 1, kind: input, shape index: {}]   ;;  %s1606_s2 = inlined_call_operand.vmem [shape: f32[1,128], index: 2, kind: input, shape index: {}]   ;;  %s1607_s3 = inlined_call_operand.vmem [shape: bf16[2048,128], index: 3, kind: output, shape index: {}]  }
   0x1   :  { %s1471_s14 = smov 0  }
   0x2 LB: > { %s32_s15 = sadd.s32 1, %s1441_s13  ;;  %p1096_p0 = scmp.ge.s32.totalorder %s1445_s14, 1  ;;  %s1445_s14 = sphi %s1471_s14, %s13_s14   ;;  %s1441_s13 = sphi %s1469_s13, %s1609_s13   ;;  %s1437_s12 = sphi %s1467_s12, %s1608_s12  }
   0x3   : > { %p34_p1 = scmp.ge.s32.totalorder %s32_s15, 8  ;;  %p188_p2 = scmp.lt.s32.totalorder %s1445_s14, 9 }
   0x5   : > { %s1611_s15 = smov (%p34_p1, %s32_s15), 0  ;;  %p189_p3 = pnand %p1096_p0, %p188_p2 }
   0x6   : > { %v1399_v0 = vld [vmem:[%s1605_s1] sm:$0xff] (!%p189_p3)   ;;  %s1097_s18 = sshll.u32 (!%p189_p3), %s1437_s12, 5  ;;  %v1400_v1 = vld [vmem:[%s1605_s1 + $0x8] sm:$0xff] (!%p189_p3)   ;;  %v1401_v2 = vld [vmem:[%s1605_s1 + $0x10] sm:$0xff] (!%p189_p3)  }
   0x7   : > { %192 = sbr.rel (%p189_p3) target bundleno = 283 (0x11b), region = 32  ;;  %p230_p4 = scmp.lt.s32.totalorder (!%p189_p3), %s1097_s18, 255  ;;  %1311 = vmatprep.subr.bf16.mxu0 (!%p189_p3), %v1399_v0  ;;  %1359 = vmatprep.subr.bf16.mxu1 (!%p189_p3), %v1399_v0  ;;  %v1402_v3 = vld [vmem:[%s1605_s1 + $0x18] sm:$0xff] (!%p189_p3)   ;;  %v1403_v6 = vld [vmem:[%s1605_s1 + $0x20] sm:$0xff] (!%p189_p3)   ;;  %v1404_v7 = vld [vmem:[%s1605_s1 + $0x28] sm:$0xff] (!%p189_p3)  }
   0x8   : > { %1312 = vmatpush3.bf16.msra.mxu0 (!%p189_p3), %v1399_v0  ;;  %1367 = vmatpush3.bf16.msra.mxu1 (!%p189_p3), %v1399_v0  ;;  %v1405_v8 = vld [vmem:[%s1605_s1 + $0x30] sm:$0xff] (!%p189_p3)   ;;  %v1406_v9 = vld [vmem:[%s1605_s1 + $0x38] sm:$0xff] (!%p189_p3)   ;;  %v1538_v25 = vld [vmem:[%s1606_s2] ss:$0 sm:$0xff] (!%p189_p3) }
   0x9   : > { %1313 = vmatprep.subr.bf16.mxu0 (!%p189_p3), %v1400_v1  ;;  %1360 = vmatprep.subr.bf16.mxu1 (!%p189_p3), %v1400_v1 }
   0xc   : > { %1314 = vmatpush3.bf16.msra.mxu0 (!%p189_p3), %v1400_v1  ;;  %1368 = vmatpush3.bf16.msra.mxu1 (!%p189_p3), %v1400_v1 }
   0xd   : > { %1315 = vmatprep.subr.bf16.mxu0 (!%p189_p3), %v1401_v2  ;;  %1361 = vmatprep.subr.bf16.mxu1 (!%p189_p3), %v1401_v2 }
   0xe   : > { %s1613_s18 = smov (!%p230_p4, %s1097_s18), 255 }
   0xf   : > { %s1098_s23 = sshll.u32 %s1613_s18, 2 }
  0x10   : > { %s1502_s26 = scalar_lea.vmem %s1604_s0, %s1098_s23  ;;  %1316 = vmatpush3.bf16.msra.mxu0 %v1401_v2  ;;  %1369 = vmatpush3.bf16.msra.mxu1 %v1401_v2  ;;  %s1551_s17 = scalar_lea.vmem %s1607_s3, %s1098_s23 }
  0x11   : > { %v1407_v4 = vld [vmem:[%s1502_s26] sm:$0xff]   ;;  %1317 = vmatprep.subr.bf16.mxu0 %v1402_v3  ;;  %1362 = vmatprep.subr.bf16.mxu1 %v1402_v3  ;;  %v1409_v10 = vld [vmem:[%s1502_s26 + $0x8] sm:$0xff]   ;;  %v1411_v12 = vld [vmem:[%s1502_s26 + $0x10] sm:$0xff]  }
  0x12   : > { %v1408_v5 = vld [vmem:[%s1502_s26 + $0x40] sm:$0xff]   ;;  %1327 = vmatprep.mubr.bf16.mxu0 %v1407_v4  ;;  %v1410_v11 = vld [vmem:[%s1502_s26 + $0x48] sm:$0xff]   ;;  %v1412_v13 = vld [vmem:[%s1502_s26 + $0x50] sm:$0xff]  }
  0x13   : > { %1343 = vmatprep.mubr.bf16.mxu1 %v1408_v5  ;;  %v1413_v14 = vld [vmem:[%s1502_s26 + $0x18] sm:$0xff]   ;;  %v1415_v16 = vld [vmem:[%s1502_s26 + $0x20] sm:$0xff]   ;;  %v1417_v18 = vld [vmem:[%s1502_s26 + $0x28] sm:$0xff]  }
  0x14   : > { %1318 = vmatpush3.bf16.msra.mxu0 %v1402_v3  ;;  %1370 = vmatpush3.bf16.msra.mxu1 %v1402_v3  ;;  %v1414_v15 = vld [vmem:[%s1502_s26 + $0x58] sm:$0xff]   ;;  %v1416_v17 = vld [vmem:[%s1502_s26 + $0x60] sm:$0xff]   ;;  %v1418_v19 = vld [vmem:[%s1502_s26 + $0x68] sm:$0xff]  }
  0x15   : > { %1319 = vmatprep.subr.bf16.mxu0 %v1403_v6  ;;  %1363 = vmatprep.subr.bf16.mxu1 %v1403_v6  ;;  %v1419_v20 = vld [vmem:[%s1502_s26 + $0x30] sm:$0xff]   ;;  %v1421_v22 = vld [vmem:[%s1502_s26 + $0x38] sm:$0xff]  }
  0x16   : > { %v1420_v21 = vld [vmem:[%s1502_s26 + $0x70] sm:$0xff]   ;;  %v1422_v23 = vld [vmem:[%s1502_s26 + $0x78] sm:$0xff]  }
  0x18   : > { %1320 = vmatpush3.bf16.msra.mxu0 %v1403_v6  ;;  %1371 = vmatpush3.bf16.msra.mxu1 %v1403_v6 }
  0x19   : > { %1321 = vmatprep.subr.bf16.mxu0 %v1404_v7  ;;  %1364 = vmatprep.subr.bf16.mxu1 %v1404_v7 }
  0x1c   : > { %1322 = vmatpush3.bf16.msra.mxu0 %v1404_v7  ;;  %1372 = vmatpush3.bf16.msra.mxu1 %v1404_v7 }
  0x1d   : > { %1323 = vmatprep.subr.bf16.mxu0 %v1405_v8  ;;  %1365 = vmatprep.subr.bf16.mxu1 %v1405_v8 }
  0x20   : > { %1324 = vmatpush3.bf16.msra.mxu0 %v1405_v8  ;;  %1373 = vmatpush3.bf16.msra.mxu1 %v1405_v8 }
  0x21   : > { %1325 = vmatprep.subr.bf16.mxu0 %v1406_v9  ;;  %1366 = vmatprep.subr.bf16.mxu1 %v1406_v9 }
  0x24   : > { %1326 = vmatpush3.bf16.msra.mxu0 %v1406_v9  ;;  %1374 = vmatpush3.bf16.msra.mxu1 %v1406_v9 }
  0x27   : > { %1328 = vmatmul.mubr.bf16.vlgmr.msra.gmra.mrb[0].mxu0 %v1409_v10  ;;  %1344 = vmatmul.mubr.bf16.vlgmr.msra.gmra.mrb[0].mxu1 %v1410_v11 }
  0x28   : > { %1331 = vmatprep.mubr.bf16.mxu0 %v1411_v12  ;;  %1347 = vmatprep.mubr.bf16.mxu1 %v1412_v13 }
  0x2f   : > { %1332 = vmatmul.mubr.bf16.gmra.mrb[4].mxu0 %v1413_v14  ;;  %1348 = vmatmul.mubr.bf16.gmra.mrb[4].mxu1 %v1414_v15 }
  0x30   : > { %1335 = vmatprep.mubr.bf16.mxu0 %v1415_v16  ;;  %1351 = vmatprep.mubr.bf16.mxu1 %v1416_v17 }
  0x37   : > { %1336 = vmatmul.mubr.bf16.gmra.mrb[8].mxu0 %v1417_v18  ;;  %1352 = vmatmul.mubr.bf16.gmra.mrb[8].mxu1 %v1418_v19 }
  0x38   : > { %1339 = vmatprep.mubr.bf16.mxu0 %v1419_v20  ;;  %1355 = vmatprep.mubr.bf16.mxu1 %v1420_v21 }
  0x3f   : > { %1340 = vmatmul.mubr.bf16.gmra.mrb[12].mxu0 %v1421_v22  ;;  %1356 = vmatmul.mubr.bf16.gmra.mrb[12].mxu1 %v1422_v23 }
  0xfa   : > { %v1329_v24 = vpop.f32.mrb[0].mxu0  ;;  %v1345_v26 = vpop.f32.mrb[0].mxu1 }
  0xfb   : > { %v554_v27 = vpop.f32.mrb[1].mxu0  ;;  %v618_v28 = vpop.f32.mrb[1].mxu1  ;;  %v789_v31 = vadd.f32 %v1329_v24, %v1538_v25  ;;  %v805_v32 = vadd.f32 %v1345_v26, %v1538_v25 }
  0xfc   : > { %v1330_v29 = vpop.f32.mrb[2].mxu0  ;;  %v1346_v30 = vpop.f32.mrb[2].mxu1  ;;  %v787_v37 = vadd.f32 %v1538_v25, %v554_v27  ;;  %v803_v38 = vadd.f32 %v1538_v25, %v618_v28 }
  0xfd   : > { %v790_v33 = vadd.f32 %v1330_v29, %v1538_v25  ;;  %v806_v34 = vadd.f32 %v1346_v30, %v1538_v25  ;;  %v557_v35 = vpop.f32.mrb[3].mxu0  ;;  %v621_v36 = vpop.f32.mrb[3].mxu1 }
  0xfe   : > { %v788_v39 = vadd.f32 %v1538_v25, %v557_v35  ;;  %v804_v40 = vadd.f32 %v1538_v25, %v621_v36 }
  0xff   : > { %v1200_v41 = vpack.c.bf16 %v790_v33, %v789_v31  ;;  %v1240_v42 = vpack.c.bf16 %v806_v34, %v805_v32 }
 0x100   : > { %v1195_v43 = vpack.c.bf16 %v788_v39, %v787_v37  ;;  %v1235_v44 = vpack.c.bf16 %v804_v40, %v803_v38 }
 0x101   : > { %1272 = vst [vmem:[%s1551_s17 + $0x8] sm:$0xff] %v1200_v41   ;;  %1280 = vst [vmem:[%s1551_s17 + $0x48] sm:$0xff] %v1240_v42  }
 0x102   : > { %1196 = vst [vmem:[%s1551_s17] sm:$0xff] %v1195_v43   ;;  %1279 = vst [vmem:[%s1551_s17 + $0x40] sm:$0xff] %v1235_v44   ;;  %v1333_v45 = vpop.f32.mrb[4].mxu0  ;;  %v1349_v46 = vpop.f32.mrb[4].mxu1 }
 0x103   : > { %v570_v47 = vpop.f32.mrb[5].mxu0  ;;  %v634_v48 = vpop.f32.mrb[5].mxu1  ;;  %v793_v51 = vadd.f32 %v1333_v45, %v1538_v25  ;;  %v809_v52 = vadd.f32 %v1349_v46, %v1538_v25 }
 0x104   : > { %v1334_v49 = vpop.f32.mrb[6].mxu0  ;;  %v1350_v50 = vpop.f32.mrb[6].mxu1  ;;  %v791_v57 = vadd.f32 %v1538_v25, %v570_v47  ;;  %v807_v58 = vadd.f32 %v1538_v25, %v634_v48 }
 0x105   : > { %v794_v53 = vadd.f32 %v1334_v49, %v1538_v25  ;;  %v810_v54 = vadd.f32 %v1350_v50, %v1538_v25  ;;  %v573_v55 = vpop.f32.mrb[7].mxu0  ;;  %v637_v56 = vpop.f32.mrb[7].mxu1 }
 0x106   : > { %v792_v59 = vadd.f32 %v1538_v25, %v573_v55  ;;  %v808_v60 = vadd.f32 %v1538_v25, %v637_v56 }
 0x107   : > { %v1210_v61 = vpack.c.bf16 %v794_v53, %v793_v51  ;;  %v1250_v62 = vpack.c.bf16 %v810_v54, %v809_v52 }
 0x108   : > { %v1205_v63 = vpack.c.bf16 %v792_v59, %v791_v57  ;;  %v1245_v0 = vpack.c.bf16 %v808_v60, %v807_v58 }
 0x109   : > { %1274 = vst [vmem:[%s1551_s17 + $0x18] sm:$0xff] %v1210_v61   ;;  %1282 = vst [vmem:[%s1551_s17 + $0x58] sm:$0xff] %v1250_v62  }
 0x10a   : > { %1273 = vst [vmem:[%s1551_s17 + $0x10] sm:$0xff] %v1205_v63   ;;  %1281 = vst [vmem:[%s1551_s17 + $0x50] sm:$0xff] %v1245_v0   ;;  %v1337_v1 = vpop.f32.mrb[8].mxu0  ;;  %v1353_v2 = vpop.f32.mrb[8].mxu1 }
 0x10b   : > { %v586_v3 = vpop.f32.mrb[9].mxu0  ;;  %v650_v4 = vpop.f32.mrb[9].mxu1  ;;  %v797_v7 = vadd.f32 %v1337_v1, %v1538_v25  ;;  %v813_v8 = vadd.f32 %v1353_v2, %v1538_v25 }
 0x10c   : > { %v1338_v5 = vpop.f32.mrb[10].mxu0  ;;  %v1354_v6 = vpop.f32.mrb[10].mxu1  ;;  %v795_v13 = vadd.f32 %v1538_v25, %v586_v3  ;;  %v811_v14 = vadd.f32 %v1538_v25, %v650_v4 }
 0x10d   : > { %v798_v9 = vadd.f32 %v1338_v5, %v1538_v25  ;;  %v814_v10 = vadd.f32 %v1354_v6, %v1538_v25  ;;  %v589_v11 = vpop.f32.mrb[11].mxu0  ;;  %v653_v12 = vpop.f32.mrb[11].mxu1 }
 0x10e   : > { %v796_v15 = vadd.f32 %v1538_v25, %v589_v11  ;;  %v812_v16 = vadd.f32 %v1538_v25, %v653_v12 }
 0x10f   : > { %v1220_v17 = vpack.c.bf16 %v798_v9, %v797_v7  ;;  %v1260_v18 = vpack.c.bf16 %v814_v10, %v813_v8 }
 0x110   : > { %v1215_v19 = vpack.c.bf16 %v796_v15, %v795_v13  ;;  %v1255_v20 = vpack.c.bf16 %v812_v16, %v811_v14 }
 0x111   : > { %1276 = vst [vmem:[%s1551_s17 + $0x28] sm:$0xff] %v1220_v17   ;;  %1284 = vst [vmem:[%s1551_s17 + $0x68] sm:$0xff] %v1260_v18  }
 0x112   : > { %1275 = vst [vmem:[%s1551_s17 + $0x20] sm:$0xff] %v1215_v19   ;;  %1283 = vst [vmem:[%s1551_s17 + $0x60] sm:$0xff] %v1255_v20   ;;  %v1341_v21 = vpop.f32.mrb[12].mxu0  ;;  %v1357_v22 = vpop.f32.mrb[12].mxu1 }
 0x113   : > { %v602_v23 = vpop.f32.mrb[13].mxu0  ;;  %v666_v24 = vpop.f32.mrb[13].mxu1  ;;  %v801_v28 = vadd.f32 %v1341_v21, %v1538_v25  ;;  %v817_v29 = vadd.f32 %v1357_v22, %v1538_v25 }
 0x114   : > { %v1342_v26 = vpop.f32.mrb[14].mxu0  ;;  %v1358_v27 = vpop.f32.mrb[14].mxu1  ;;  %v799_v34 = vadd.f32 %v1538_v25, %v602_v23  ;;  %v815_v35 = vadd.f32 %v1538_v25, %v666_v24 }
 0x115   : > { %v802_v30 = vadd.f32 %v1342_v26, %v1538_v25  ;;  %v818_v31 = vadd.f32 %v1358_v27, %v1538_v25  ;;  %v605_v32 = vpop.f32.mrb[15].mxu0  ;;  %v669_v33 = vpop.f32.mrb[15].mxu1 }
 0x116   : > { %v800_v36 = vadd.f32 %v1538_v25, %v605_v32  ;;  %v816_v37 = vadd.f32 %v1538_v25, %v669_v33 }
 0x117   : > { %v1230_v38 = vpack.c.bf16 %v802_v30, %v801_v28  ;;  %v1270_v39 = vpack.c.bf16 %v818_v31, %v817_v29 }
 0x118   : > { %v1225_v40 = vpack.c.bf16 %v800_v36, %v799_v34  ;;  %v1265_v41 = vpack.c.bf16 %v816_v37, %v815_v35 }
 0x119   : > { %1278 = vst [vmem:[%s1551_s17 + $0x38] sm:$0xff] %v1230_v38   ;;  %1286 = vst [vmem:[%s1551_s17 + $0x78] sm:$0xff] %v1270_v39  }
 0x11a   : > { %1277 = vst [vmem:[%s1551_s17 + $0x30] sm:$0xff] %v1225_v40   ;;  %1285 = vst [vmem:[%s1551_s17 + $0x70] sm:$0xff] %v1265_v41  }
 0x11b PF: > { %s13_s14 = sadd.s32 1, %s1445_s14   ;;  %s1608_s12 = smov %s1441_s13 }
 0x11c   : > { %p10_p5 = scmp.ge.s32.totalorder %s13_s14, 10   ;;  %s1609_s13 = smov %s1611_s15 }
 0x11e   :  { %12 = sbr.rel (!%p10_p5) target bundleno = 2 (0x2), region = 76 }

// kernel: discriminator_forward.6
= control target key start
LH: loop header
LB: loop body
LE: loop exit
PB: predicated region body
PF: predicated region fallthrough
CT: control target
= control target key end

     0   :  { %s1712_s12 = smov 0   ;;  %s1714_s13 = smov 0   ;;  %s1886_s0 = inlined_call_operand.vmem [shape: bf16[512,256], index: 0, kind: input, shape index: {}]   ;;  %s1887_s1 = inlined_call_operand.vmem [shape: bf16[256,128], index: 1, kind: input, shape index: {}]   ;;  %s1888_s2 = inlined_call_operand.vmem [shape: f32[1,128], index: 2, kind: input, shape index: {}]   ;;  %s1889_s3 = inlined_call_operand.vmem [shape: bf16[512,128], index: 3, kind: output, shape index: {}]  }
   0x1   :  { %s1716_s14 = smov 0  }
   0x2 LB: > { %s32_s15 = sadd.s32 1, %s1686_s13  ;;  %p1235_p0 = scmp.ge.s32.totalorder %s1690_s14, 1  ;;  %s1690_s14 = sphi %s1716_s14, %s13_s14   ;;  %s1686_s13 = sphi %s1714_s13, %s1891_s13   ;;  %s1682_s12 = sphi %s1712_s12, %s1890_s12  }
   0x3   : > { %p34_p1 = scmp.ge.s32.totalorder %s32_s15, 2  ;;  %p191_p2 = scmp.lt.s32.totalorder %s1690_s14, 3 }
   0x5   : > { %s1893_s15 = smov (%p34_p1, %s32_s15), 0  ;;  %p192_p3 = pnand %p1235_p0, %p191_p2 }
   0x6   : > { %v1604_v0 = vld [vmem:[%s1887_s1 + $0x40] sm:$0xff] (!%p192_p3)   ;;  %s1236_s18 = sshll.u32 (!%p192_p3), %s1682_s12, 5  ;;  %v1606_v2 = vld [vmem:[%s1887_s1 + $0x48] sm:$0xff] (!%p192_p3)   ;;  %v1608_v4 = vld [vmem:[%s1887_s1 + $0x50] sm:$0xff] (!%p192_p3)  }
   0x7   : > { %195 = sbr.rel (%p192_p3) target bundleno = 317 (0x13d), region = 32  ;;  %v1605_v1 = vld [vmem:[%s1887_s1] sm:$0xff] (!%p192_p3)   ;;  %1452 = vmatprep.subr.bf16.mxu0 (!%p192_p3), %v1604_v0  ;;  %1564 = vmatprep.subr.bf16.mxu1 (!%p192_p3), %v1604_v0  ;;  %v1607_v3 = vld [vmem:[%s1887_s1 + $0x8] sm:$0xff] (!%p192_p3)   ;;  %p236_p4 = scmp.lt.s32.totalorder (!%p192_p3), %s1236_s18, 63  ;;  %v1609_v5 = vld [vmem:[%s1887_s1 + $0x10] sm:$0xff] (!%p192_p3)  }
   0x8   : > { %1453 = vmatpush3.bf16.msra.mxu0 (!%p192_p3), %v1605_v1  ;;  %1572 = vmatpush3.bf16.msra.mxu1 (!%p192_p3), %v1605_v1  ;;  %v1610_v6 = vld [vmem:[%s1887_s1 + $0x58] sm:$0xff] (!%p192_p3)   ;;  %v1612_v8 = vld [vmem:[%s1887_s1 + $0x60] sm:$0xff] (!%p192_p3)   ;;  %v1614_v10 = vld [vmem:[%s1887_s1 + $0x68] sm:$0xff] (!%p192_p3)  }
   0x9   : > { %1454 = vmatprep.subr.bf16.mxu0 (!%p192_p3), %v1606_v2  ;;  %1565 = vmatprep.subr.bf16.mxu1 (!%p192_p3), %v1606_v2  ;;  %v1611_v7 = vld [vmem:[%s1887_s1 + $0x18] sm:$0xff] (!%p192_p3)   ;;  %v1613_v9 = vld [vmem:[%s1887_s1 + $0x20] sm:$0xff] (!%p192_p3)   ;;  %v1615_v13 = vld [vmem:[%s1887_s1 + $0x28] sm:$0xff] (!%p192_p3)  }
   0xa   : > { %v1616_v14 = vld [vmem:[%s1887_s1 + $0x70] sm:$0xff] (!%p192_p3)   ;;  %v1618_v16 = vld [vmem:[%s1887_s1 + $0x78] sm:$0xff] (!%p192_p3)   ;;  %v1821_v56 = vld [vmem:[%s1888_s2] ss:$0 sm:$0xff] (!%p192_p3) }
   0xb   : > { %v1617_v15 = vld [vmem:[%s1887_s1 + $0x30] sm:$0xff] (!%p192_p3)   ;;  %v1619_v17 = vld [vmem:[%s1887_s1 + $0x38] sm:$0xff] (!%p192_p3)  }
   0xc   : > { %1455 = vmatpush3.bf16.msra.mxu0 (!%p192_p3), %v1607_v3  ;;  %1573 = vmatpush3.bf16.msra.mxu1 (!%p192_p3), %v1607_v3 }
   0xd   : > { %1456 = vmatprep.subr.bf16.mxu0 (!%p192_p3), %v1608_v4  ;;  %1566 = vmatprep.subr.bf16.mxu1 (!%p192_p3), %v1608_v4 }
   0xe   : > { %s1895_s18 = smov (!%p236_p4, %s1236_s18), 63 }
   0xf   : > { %s1324_s6 = sshll.u32 %s1895_s18, 3  ;;  %s1240_s5 = sshll.u32 %s1895_s18, 2 }
  0x10   : > { %1457 = vmatpush3.bf16.msra.mxu0 %v1609_v5  ;;  %1574 = vmatpush3.bf16.msra.mxu1 %v1609_v5  ;;  %s1763_s11 = scalar_lea.vmem %s1886_s0, %s1324_s6  ;;  %s1831_s8 = scalar_lea.vmem %s1889_s3, %s1240_s5 }
  0x11   : > { %1458 = vmatprep.subr.bf16.mxu0 %v1610_v6  ;;  %1567 = vmatprep.subr.bf16.mxu1 %v1610_v6  ;;  %v1622_v11 = vld [vmem:[%s1763_s11 + $0x4] ss:$8 sps:$4 sm:$0xff]   ;;  %v1620_v18 = vld [vmem:[%s1763_s11] ss:$8 sps:$4 sm:$0xff]   ;;  %v1626_v20 = vld [vmem:[%s1763_s11 + $0x14] ss:$8 sps:$4 sm:$0xff]  }
  0x12   : > { %v1625_v12 = vld [vmem:[%s1763_s11 + $0x84] ss:$8 sps:$4 sm:$0xff]   ;;  %688 = vmatprep.mubr.bf16.mxu0 %v1622_v11  ;;  %v1623_v19 = vld [vmem:[%s1763_s11 + $0x80] ss:$8 sps:$4 sm:$0xff]   ;;  %v1628_v21 = vld [vmem:[%s1763_s11 + $0x94] ss:$8 sps:$4 sm:$0xff]  }
  0x13   : > { %752 = vmatprep.mubr.bf16.mxu1 %v1625_v12  ;;  %v1630_v22 = vld [vmem:[%s1763_s11 + $0x10] ss:$8 sps:$4 sm:$0xff]   ;;  %v1632_v24 = vld [vmem:[%s1763_s11 + $0x24] ss:$8 sps:$4 sm:$0xff]   ;;  %v1636_v26 = vld [vmem:[%s1763_s11 + $0x20] ss:$8 sps:$4 sm:$0xff]  }
  0x14   : > { %1459 = vmatpush3.bf16.msra.mxu0 %v1611_v7  ;;  %1575 = vmatpush3.bf16.msra.mxu1 %v1611_v7  ;;  %v1631_v23 = vld [vmem:[%s1763_s11 + $0x90] ss:$8 sps:$4 sm:$0xff]   ;;  %v1634_v25 = vld [vmem:[%s1763_s11 + $0xa4] ss:$8 sps:$4 sm:$0xff]   ;;  %v1637_v27 = vld [vmem:[%s1763_s11 + $0xa0] ss:$8 sps:$4 sm:$0xff]  }
  0x15   : > { %1460 = vmatprep.subr.bf16.mxu0 %v1612_v8  ;;  %1568 = vmatprep.subr.bf16.mxu1 %v1612_v8  ;;  %v1638_v28 = vld [vmem:[%s1763_s11 + $0x34] ss:$8 sps:$4 sm:$0xff]   ;;  %v1642_v30 = vld [vmem:[%s1763_s11 + $0x30] ss:$8 sps:$4 sm:$0xff]   ;;  %v1644_v32 = vld [vmem:[%s1763_s11 + $0x44] ss:$8 sps:$4 sm:$0xff]  }
  0x16   : > { %v1640_v29 = vld [vmem:[%s1763_s11 + $0xb4] ss:$8 sps:$4 sm:$0xff]   ;;  %v1643_v31 = vld [vmem:[%s1763_s11 + $0xb0] ss:$8 sps:$4 sm:$0xff]   ;;  %v1646_v33 = vld [vmem:[%s1763_s11 + $0xc4] ss:$8 sps:$4 sm:$0xff]  }
  0x17   : > { %v1648_v34 = vld [vmem:[%s1763_s11 + $0x40] ss:$8 sps:$4 sm:$0xff]   ;;  %v1650_v36 = vld [vmem:[%s1763_s11 + $0x54] ss:$8 sps:$4 sm:$0xff]   ;;  %v1654_v38 = vld [vmem:[%s1763_s11 + $0x50] ss:$8 sps:$4 sm:$0xff]  }
  0x18   : > { %1461 = vmatpush3.bf16.msra.mxu0 %v1613_v9  ;;  %1576 = vmatpush3.bf16.msra.mxu1 %v1613_v9  ;;  %v1649_v35 = vld [vmem:[%s1763_s11 + $0xc0] ss:$8 sps:$4 sm:$0xff]   ;;  %v1652_v37 = vld [vmem:[%s1763_s11 + $0xd4] ss:$8 sps:$4 sm:$0xff]   ;;  %v1655_v39 = vld [vmem:[%s1763_s11 + $0xd0] ss:$8 sps:$4 sm:$0xff]  }
  0x19   : > { %1462 = vmatprep.subr.bf16.mxu0 %v1614_v10  ;;  %1569 = vmatprep.subr.bf16.mxu1 %v1614_v10  ;;  %v1656_v40 = vld [vmem:[%s1763_s11 + $0x64] ss:$8 sps:$4 sm:$0xff]   ;;  %v1660_v42 = vld [vmem:[%s1763_s11 + $0x60] ss:$8 sps:$4 sm:$0xff]   ;;  %v1662_v44 = vld [vmem:[%s1763_s11 + $0x74] ss:$8 sps:$4 sm:$0xff]  }
  0x1a   : > { %v1658_v41 = vld [vmem:[%s1763_s11 + $0xe4] ss:$8 sps:$4 sm:$0xff]   ;;  %v1661_v43 = vld [vmem:[%s1763_s11 + $0xe0] ss:$8 sps:$4 sm:$0xff]   ;;  %v1664_v45 = vld [vmem:[%s1763_s11 + $0xf4] ss:$8 sps:$4 sm:$0xff]  }
  0x1b   : > { %v1666_v46 = vld [vmem:[%s1763_s11 + $0x70] ss:$8 sps:$4 sm:$0xff]  }
  0x1c   : > { %1463 = vmatpush3.bf16.msra.mxu0 %v1615_v13  ;;  %1577 = vmatpush3.bf16.msra.mxu1 %v1615_v13  ;;  %v1667_v47 = vld [vmem:[%s1763_s11 + $0xf0] ss:$8 sps:$4 sm:$0xff]  }
  0x1d   : > { %1464 = vmatprep.subr.bf16.mxu0 %v1616_v14  ;;  %1570 = vmatprep.subr.bf16.mxu1 %v1616_v14 }
  0x20   : > { %1465 = vmatpush3.bf16.msra.mxu0 %v1617_v15  ;;  %1578 = vmatpush3.bf16.msra.mxu1 %v1617_v15 }
  0x21   : > { %1466 = vmatprep.subr.bf16.mxu0 %v1618_v16  ;;  %1571 = vmatprep.subr.bf16.mxu1 %v1618_v16 }
  0x24   : > { %1467 = vmatpush3.bf16.msra.mxu0 %v1619_v17  ;;  %1579 = vmatpush3.bf16.msra.mxu1 %v1619_v17 }
  0x27   : > { %689 = vmatmul.mubr.bf16.vlgmr.msra.gmra.mrb[0].mxu0 %v1620_v18  ;;  %753 = vmatmul.mubr.bf16.vlgmr.msra.gmra.mrb[0].mxu1 %v1623_v19 }
  0x28   : > { %696 = vmatprep.mubr.bf16.mxu0 %v1626_v20  ;;  %760 = vmatprep.mubr.bf16.mxu1 %v1628_v21 }
  0x2f   : > { %697 = vmatmul.mubr.bf16.gmra.mrb[4].mxu0 %v1630_v22  ;;  %761 = vmatmul.mubr.bf16.gmra.mrb[4].mxu1 %v1631_v23 }
  0x30   : > { %704 = vmatprep.mubr.bf16.mxu0 %v1632_v24  ;;  %768 = vmatprep.mubr.bf16.mxu1 %v1634_v25 }
  0x37   : > { %705 = vmatmul.mubr.bf16.gmra.mrb[8].mxu0 %v1636_v26  ;;  %769 = vmatmul.mubr.bf16.gmra.mrb[8].mxu1 %v1637_v27 }
  0x38   : > { %712 = vmatprep.mubr.bf16.mxu0 %v1638_v28  ;;  %776 = vmatprep.mubr.bf16.mxu1 %v1640_v29 }
  0x3f   : > { %713 = vmatmul.mubr.bf16.gmra.mrb[12].mxu0 %v1642_v30  ;;  %777 = vmatmul.mubr.bf16.gmra.mrb[12].mxu1 %v1643_v31 }
  0x40   : > { %720 = vmatprep.mubr.bf16.mxu0 %v1644_v32  ;;  %784 = vmatprep.mubr.bf16.mxu1 %v1646_v33 }
  0x47   : > { %721 = vmatmul.mubr.bf16.gmra.mrb[16].mxu0 %v1648_v34  ;;  %785 = vmatmul.mubr.bf16.gmra.mrb[16].mxu1 %v1649_v35 }
  0x48   : > { %728 = vmatprep.mubr.bf16.mxu0 %v1650_v36  ;;  %792 = vmatprep.mubr.bf16.mxu1 %v1652_v37 }
  0x4f   : > { %729 = vmatmul.mubr.bf16.gmra.mrb[20].mxu0 %v1654_v38  ;;  %793 = vmatmul.mubr.bf16.gmra.mrb[20].mxu1 %v1655_v39 }
  0x50   : > { %736 = vmatprep.mubr.bf16.mxu0 %v1656_v40  ;;  %800 = vmatprep.mubr.bf16.mxu1 %v1658_v41 }
  0x57   : > { %737 = vmatmul.mubr.bf16.gmra.mrb[24].mxu0 %v1660_v42  ;;  %801 = vmatmul.mubr.bf16.gmra.mrb[24].mxu1 %v1661_v43 }
  0x58   : > { %744 = vmatprep.mubr.bf16.mxu0 %v1662_v44  ;;  %808 = vmatprep.mubr.bf16.mxu1 %v1664_v45 }
  0x5f   : > { %745 = vmatmul.mubr.bf16.gmra.mrb[28].mxu0 %v1666_v46  ;;  %809 = vmatmul.mubr.bf16.gmra.mrb[28].mxu1 %v1667_v47 }
  0xfa   : > { %v1468_v48 = vpop.f32.mrb[0].mxu0  ;;  %v1516_v49 = vpop.f32.mrb[0].mxu1 }
  0xfb   : > { %v1469_v50 = vpop.f32.mrb[1].mxu0  ;;  %v1517_v51 = vpop.f32.mrb[1].mxu1 }
  0xfc   : > { %v1470_v52 = vadd.f32 %v1469_v50, %v1468_v48  ;;  %v1518_v53 = vadd.f32 %v1517_v51, %v1516_v49  ;;  %v1471_v54 = vpop.f32.mrb[2].mxu0  ;;  %v1519_v55 = vpop.f32.mrb[2].mxu1 }
  0xfd   : > { %v1472_v57 = vpop.f32.mrb[3].mxu0  ;;  %v1520_v58 = vpop.f32.mrb[3].mxu1 }
  0xfe   : > { %v1473_v59 = vadd.f32 %v1472_v57, %v1471_v54  ;;  %v1521_v60 = vadd.f32 %v1520_v58, %v1519_v55  ;;  %v923_v61 = vadd.f32 %v1470_v52, %v1821_v56  ;;  %v939_v62 = vadd.f32 %v1518_v53, %v1821_v56 }
 0x100   : > { %v924_v63 = vadd.f32 %v1473_v59, %v1821_v56  ;;  %v940_v0 = vadd.f32 %v1521_v60, %v1821_v56 }
 0x102   : > { %v1360_v1 = vpack.c.bf16 %v924_v63, %v923_v61  ;;  %v1400_v2 = vpack.c.bf16 %v940_v0, %v939_v62  ;;  %v1474_v3 = vpop.f32.mrb[4].mxu0  ;;  %v1522_v4 = vpop.f32.mrb[4].mxu1 }
 0x103   : > { %v1475_v5 = vpop.f32.mrb[5].mxu0  ;;  %v1523_v6 = vpop.f32.mrb[5].mxu1 }
 0x104   : > { %1361 = vst [vmem:[%s1831_s8] sm:$0xff] %v1360_v1   ;;  %1444 = vst [vmem:[%s1831_s8 + $0x40] sm:$0xff] %v1400_v2   ;;  %v1476_v7 = vadd.f32 %v1475_v5, %v1474_v3  ;;  %v1524_v8 = vadd.f32 %v1523_v6, %v1522_v4  ;;  %v1477_v9 = vpop.f32.mrb[6].mxu0  ;;  %v1525_v10 = vpop.f32.mrb[6].mxu1 }
 0x105   : > { %v1478_v11 = vpop.f32.mrb[7].mxu0  ;;  %v1526_v12 = vpop.f32.mrb[7].mxu1 }
 0x106   : > { %v1479_v13 = vadd.f32 %v1478_v11, %v1477_v9  ;;  %v1527_v14 = vadd.f32 %v1526_v12, %v1525_v10  ;;  %v925_v15 = vadd.f32 %v1476_v7, %v1821_v56  ;;  %v941_v16 = vadd.f32 %v1524_v8, %v1821_v56 }
 0x108   : > { %v926_v17 = vadd.f32 %v1479_v13, %v1821_v56  ;;  %v942_v18 = vadd.f32 %v1527_v14, %v1821_v56 }
 0x10a   : > { %v1365_v19 = vpack.c.bf16 %v926_v17, %v925_v15  ;;  %v1405_v20 = vpack.c.bf16 %v942_v18, %v941_v16  ;;  %v1480_v21 = vpop.f32.mrb[8].mxu0  ;;  %v1528_v22 = vpop.f32.mrb[8].mxu1 }
 0x10b   : > { %v1481_v23 = vpop.f32.mrb[9].mxu0  ;;  %v1529_v24 = vpop.f32.mrb[9].mxu1 }
 0x10c   : > { %1437 = vst [vmem:[%s1831_s8 + $0x8] sm:$0xff] %v1365_v19   ;;  %1445 = vst [vmem:[%s1831_s8 + $0x48] sm:$0xff] %v1405_v20   ;;  %v1482_v25 = vadd.f32 %v1481_v23, %v1480_v21  ;;  %v1530_v26 = vadd.f32 %v1529_v24, %v1528_v22  ;;  %v1483_v27 = vpop.f32.mrb[10].mxu0  ;;  %v1531_v28 = vpop.f32.mrb[10].mxu1 }
 0x10d   : > { %v1484_v29 = vpop.f32.mrb[11].mxu0  ;;  %v1532_v30 = vpop.f32.mrb[11].mxu1 }
 0x10e   : > { %v1485_v31 = vadd.f32 %v1484_v29, %v1483_v27  ;;  %v1533_v32 = vadd.f32 %v1532_v30, %v1531_v28  ;;  %v927_v33 = vadd.f32 %v1482_v25, %v1821_v56  ;;  %v943_v34 = vadd.f32 %v1530_v26, %v1821_v56 }
 0x110   : > { %v928_v35 = vadd.f32 %v1485_v31, %v1821_v56  ;;  %v944_v36 = vadd.f32 %v1533_v32, %v1821_v56 }
 0x112   : > { %v1370_v37 = vpack.c.bf16 %v928_v35, %v927_v33  ;;  %v1410_v38 = vpack.c.bf16 %v944_v36, %v943_v34  ;;  %v1486_v39 = vpop.f32.mrb[12].mxu0  ;;  %v1534_v40 = vpop.f32.mrb[12].mxu1 }
 0x113   : > { %v1487_v41 = vpop.f32.mrb[13].mxu0  ;;  %v1535_v42 = vpop.f32.mrb[13].mxu1 }
 0x114   : > { %1438 = vst [vmem:[%s1831_s8 + $0x10] sm:$0xff] %v1370_v37   ;;  %1446 = vst [vmem:[%s1831_s8 + $0x50] sm:$0xff] %v1410_v38   ;;  %v1488_v43 = vadd.f32 %v1487_v41, %v1486_v39  ;;  %v1536_v44 = vadd.f32 %v1535_v42, %v1534_v40  ;;  %v1489_v45 = vpop.f32.mrb[14].mxu0  ;;  %v1537_v46 = vpop.f32.mrb[14].mxu1 }
 0x115   : > { %v1490_v47 = vpop.f32.mrb[15].mxu0  ;;  %v1538_v48 = vpop.f32.mrb[15].mxu1 }
 0x116   : > { %v1491_v49 = vadd.f32 %v1490_v47, %v1489_v45  ;;  %v1539_v50 = vadd.f32 %v1538_v48, %v1537_v46  ;;  %v929_v51 = vadd.f32 %v1488_v43, %v1821_v56  ;;  %v945_v52 = vadd.f32 %v1536_v44, %v1821_v56 }
 0x118   : > { %v930_v53 = vadd.f32 %v1491_v49, %v1821_v56  ;;  %v946_v54 = vadd.f32 %v1539_v50, %v1821_v56 }
 0x11a   : > { %v1375_v55 = vpack.c.bf16 %v930_v53, %v929_v51  ;;  %v1415_v57 = vpack.c.bf16 %v946_v54, %v945_v52  ;;  %v1492_v58 = vpop.f32.mrb[16].mxu0  ;;  %v1540_v59 = vpop.f32.mrb[16].mxu1 }
 0x11b   : > { %v1493_v60 = vpop.f32.mrb[17].mxu0  ;;  %v1541_v61 = vpop.f32.mrb[17].mxu1 }
 0x11c   : > { %1439 = vst [vmem:[%s1831_s8 + $0x18] sm:$0xff] %v1375_v55   ;;  %1447 = vst [vmem:[%s1831_s8 + $0x58] sm:$0xff] %v1415_v57   ;;  %v1494_v62 = vadd.f32 %v1493_v60, %v1492_v58  ;;  %v1542_v63 = vadd.f32 %v1541_v61, %v1540_v59  ;;  %v1495_v0 = vpop.f32.mrb[18].mxu0  ;;  %v1543_v1 = vpop.f32.mrb[18].mxu1 }
 0x11d   : > { %v1496_v2 = vpop.f32.mrb[19].mxu0  ;;  %v1544_v3 = vpop.f32.mrb[19].mxu1 }
 0x11e   : > { %v1497_v4 = vadd.f32 %v1496_v2, %v1495_v0  ;;  %v1545_v5 = vadd.f32 %v1544_v3, %v1543_v1  ;;  %v931_v6 = vadd.f32 %v1494_v62, %v1821_v56  ;;  %v947_v7 = vadd.f32 %v1542_v63, %v1821_v56 }
 0x120   : > { %v932_v8 = vadd.f32 %v1497_v4, %v1821_v56  ;;  %v948_v9 = vadd.f32 %v1545_v5, %v1821_v56 }
 0x122   : > { %v1380_v10 = vpack.c.bf16 %v932_v8, %v931_v6  ;;  %v1420_v11 = vpack.c.bf16 %v948_v9, %v947_v7  ;;  %v1498_v12 = vpop.f32.mrb[20].mxu0  ;;  %v1546_v13 = vpop.f32.mrb[20].mxu1 }
 0x123   : > { %v1499_v14 = vpop.f32.mrb[21].mxu0  ;;  %v1547_v15 = vpop.f32.mrb[21].mxu1 }
 0x124   : > { %1440 = vst [vmem:[%s1831_s8 + $0x20] sm:$0xff] %v1380_v10   ;;  %1448 = vst [vmem:[%s1831_s8 + $0x60] sm:$0xff] %v1420_v11   ;;  %v1500_v16 = vadd.f32 %v1499_v14, %v1498_v12  ;;  %v1548_v17 = vadd.f32 %v1547_v15, %v1546_v13  ;;  %v1501_v18 = vpop.f32.mrb[22].mxu0  ;;  %v1549_v19 = vpop.f32.mrb[22].mxu1 }
 0x125   : > { %v1502_v20 = vpop.f32.mrb[23].mxu0  ;;  %v1550_v21 = vpop.f32.mrb[23].mxu1 }
 0x126   : > { %v1503_v22 = vadd.f32 %v1502_v20, %v1501_v18  ;;  %v1551_v23 = vadd.f32 %v1550_v21, %v1549_v19  ;;  %v933_v24 = vadd.f32 %v1500_v16, %v1821_v56  ;;  %v949_v25 = vadd.f32 %v1548_v17, %v1821_v56 }
 0x128   : > { %v934_v26 = vadd.f32 %v1503_v22, %v1821_v56  ;;  %v950_v27 = vadd.f32 %v1551_v23, %v1821_v56 }
 0x12a   : > { %v1385_v28 = vpack.c.bf16 %v934_v26, %v933_v24  ;;  %v1425_v29 = vpack.c.bf16 %v950_v27, %v949_v25  ;;  %v1504_v30 = vpop.f32.mrb[24].mxu0  ;;  %v1552_v31 = vpop.f32.mrb[24].mxu1 }
 0x12b   : > { %v1505_v32 = vpop.f32.mrb[25].mxu0  ;;  %v1553_v33 = vpop.f32.mrb[25].mxu1 }
 0x12c   : > { %1441 = vst [vmem:[%s1831_s8 + $0x28] sm:$0xff] %v1385_v28   ;;  %1449 = vst [vmem:[%s1831_s8 + $0x68] sm:$0xff] %v1425_v29   ;;  %v1506_v34 = vadd.f32 %v1505_v32, %v1504_v30  ;;  %v1554_v35 = vadd.f32 %v1553_v33, %v1552_v31  ;;  %v1507_v36 = vpop.f32.mrb[26].mxu0  ;;  %v1555_v37 = vpop.f32.mrb[26].mxu1 }
 0x12d   : > { %v1508_v38 = vpop.f32.mrb[27].mxu0  ;;  %v1556_v39 = vpop.f32.mrb[27].mxu1 }
 0x12e   : > { %v1509_v40 = vadd.f32 %v1508_v38, %v1507_v36  ;;  %v1557_v41 = vadd.f32 %v1556_v39, %v1555_v37  ;;  %v935_v42 = vadd.f32 %v1506_v34, %v1821_v56  ;;  %v951_v43 = vadd.f32 %v1554_v35, %v1821_v56 }
 0x130   : > { %v936_v44 = vadd.f32 %v1509_v40, %v1821_v56  ;;  %v952_v45 = vadd.f32 %v1557_v41, %v1821_v56 }
 0x132   : > { %v1390_v46 = vpack.c.bf16 %v936_v44, %v935_v42  ;;  %v1430_v47 = vpack.c.bf16 %v952_v45, %v951_v43  ;;  %v1510_v48 = vpop.f32.mrb[28].mxu0  ;;  %v1558_v49 = vpop.f32.mrb[28].mxu1 }
 0x133   : > { %v1511_v50 = vpop.f32.mrb[29].mxu0  ;;  %v1559_v51 = vpop.f32.mrb[29].mxu1 }
 0x134   : > { %1442 = vst [vmem:[%s1831_s8 + $0x30] sm:$0xff] %v1390_v46   ;;  %1450 = vst [vmem:[%s1831_s8 + $0x70] sm:$0xff] %v1430_v47   ;;  %v1512_v52 = vadd.f32 %v1511_v50, %v1510_v48  ;;  %v1560_v53 = vadd.f32 %v1559_v51, %v1558_v49  ;;  %v1513_v54 = vpop.f32.mrb[30].mxu0  ;;  %v1561_v55 = vpop.f32.mrb[30].mxu1 }
 0x135   : > { %v1514_v57 = vpop.f32.mrb[31].mxu0  ;;  %v1562_v58 = vpop.f32.mrb[31].mxu1 }
 0x136   : > { %v1515_v59 = vadd.f32 %v1514_v57, %v1513_v54  ;;  %v1563_v60 = vadd.f32 %v1562_v58, %v1561_v55  ;;  %v937_v61 = vadd.f32 %v1512_v52, %v1821_v56  ;;  %v953_v62 = vadd.f32 %v1560_v53, %v1821_v56 }
 0x138   : > { %v938_v63 = vadd.f32 %v1515_v59, %v1821_v56  ;;  %v954_v0 = vadd.f32 %v1563_v60, %v1821_v56 }
 0x13a   : > { %v1395_v1 = vpack.c.bf16 %v938_v63, %v937_v61  ;;  %v1435_v2 = vpack.c.bf16 %v954_v0, %v953_v62 }
 0x13c   : > { %1443 = vst [vmem:[%s1831_s8 + $0x38] sm:$0xff] %v1395_v1   ;;  %1451 = vst [vmem:[%s1831_s8 + $0x78] sm:$0xff] %v1435_v2  }
 0x13d PF: > { %s13_s14 = sadd.s32 1, %s1690_s14   ;;  %s1890_s12 = smov %s1686_s13 }
 0x13e   : > { %p10_p5 = scmp.ge.s32.totalorder %s13_s14, 4   ;;  %s1891_s13 = smov %s1893_s15 }
 0x140   :  { %12 = sbr.rel (!%p10_p5) target bundleno = 2 (0x2), region = 76 }

// kernel: discriminator_forward.7
= control target key start
LH: loop header
LB: loop body
LE: loop exit
PB: predicated region body
PF: predicated region fallthrough
CT: control target
= control target key end

     0   :  { %s1260_s1 = inlined_call_operand.vmem [shape: bf16[384,128], index: 1, kind: input, shape index: {}]   ;;  %s1261_s0 = inlined_call_operand.vmem [shape: bf16[128,384], index: 0, kind: input, shape index: {}]   ;;  %s1262_s2 = inlined_call_operand.vmem [shape: f32[1,128], index: 2, kind: input, shape index: {}]   ;;  %s1263_s3 = inlined_call_operand.vmem [shape: bf16[128,128], index: 3, kind: output, shape index: {}]  }
   0x1   :  { %v995_v0 = vld [vmem:[%s1260_s1 + $0x40] sm:$0xff]   ;;  %v998_v3 = vld [vmem:[%s1260_s1 + $0x48] sm:$0xff]   ;;  %v1001_v6 = vld [vmem:[%s1260_s1 + $0x50] sm:$0xff]  }
   0x2   :  { %v996_v1 = vld [vmem:[%s1260_s1] sm:$0xff]   ;;  %883 = vmatprep.subr.bf16.mxu0 %v995_v0  ;;  %v999_v4 = vld [vmem:[%s1260_s1 + $0x8] sm:$0xff]   ;;  %v1002_v7 = vld [vmem:[%s1260_s1 + $0x10] sm:$0xff]  }
   0x3   :  { %v997_v2 = vld [vmem:[%s1260_s1 + $0x80] sm:$0xff]   ;;  %884 = vmatpush3.bf16.msra.mxu0 %v996_v1  ;;  %v1000_v5 = vld [vmem:[%s1260_s1 + $0x88] sm:$0xff]   ;;  %v1003_v8 = vld [vmem:[%s1260_s1 + $0x90] sm:$0xff]  }
   0x4   :  { %963 = vmatprep.subr.bf16.mxu1 %v997_v2  ;;  %885 = vmatprep.subr.bf16.mxu0 %v998_v3  ;;  %v1004_v9 = vld [vmem:[%s1260_s1 + $0x58] sm:$0xff]   ;;  %v1007_v12 = vld [vmem:[%s1260_s1 + $0x60] sm:$0xff]   ;;  %v1010_v15 = vld [vmem:[%s1260_s1 + $0x68] sm:$0xff]  }
   0x5   :  { %964 = vmatpush3.bf16.msra.mxu1 %v997_v2  ;;  %v1005_v10 = vld [vmem:[%s1260_s1 + $0x18] sm:$0xff]   ;;  %v1009_v13 = vld [vmem:[%s1260_s1 + $0xa0] sm:$0xff]   ;;  %v1012_v16 = vld [vmem:[%s1260_s1 + $0xa8] sm:$0xff]  }
   0x6   :  { %965 = vmatprep.subr.bf16.mxu1 %v1000_v5  ;;  %v1006_v11 = vld [vmem:[%s1260_s1 + $0x98] sm:$0xff]   ;;  %v1008_v14 = vld [vmem:[%s1260_s1 + $0x20] sm:$0xff]   ;;  %v1011_v17 = vld [vmem:[%s1260_s1 + $0x28] sm:$0xff]  }
   0x7   :  { %886 = vmatpush3.bf16.msra.mxu0 %v999_v4  ;;  %v1013_v18 = vld [vmem:[%s1260_s1 + $0x70] sm:$0xff]   ;;  %v1016_v21 = vld [vmem:[%s1260_s1 + $0x78] sm:$0xff]   ;;  %v1019_v26 = vld [vmem:[%s1261_s0] ss:$12 sps:$4 sm:$0xff]  }
   0x8   :  { %887 = vmatprep.subr.bf16.mxu0 %v1001_v6  ;;  %v1014_v19 = vld [vmem:[%s1260_s1 + $0x30] sm:$0xff]   ;;  %v1018_v22 = vld [vmem:[%s1260_s1 + $0xb8] sm:$0xff]   ;;  %v1023_v28 = vld [vmem:[%s1261_s0 + $0x20] ss:$12 sps:$4 sm:$0xff]  }
   0x9   :  { %966 = vmatpush3.bf16.msra.mxu1 %v1000_v5  ;;  %v1015_v20 = vld [vmem:[%s1260_s1 + $0xb0] sm:$0xff]   ;;  %v1017_v25 = vld [vmem:[%s1260_s1 + $0x38] sm:$0xff]   ;;  %v1039_v36 = vld [vmem:[%s1261_s0 + $0x80] ss:$12 sps:$4 sm:$0xff]  }
   0xa   :  { %967 = vmatprep.subr.bf16.mxu1 %v1003_v8  ;;  %v1021_v23 = vld [vmem:[%s1261_s0 + $0x4] ss:$12 sps:$4 sm:$0xff]   ;;  %v1022_v24 = vld [vmem:[%s1261_s0 + $0x8] ss:$12 sps:$4 sm:$0xff]   ;;  %v1032_v35 = vld [vmem:[%s1261_s0 + $0x4c] ss:$12 sps:$4 sm:$0xff]  }
   0xb   :  { %888 = vmatpush3.bf16.msra.mxu0 %v1002_v7  ;;  %435 = vmatprep.mubr.bf16.mxu0 %v1021_v23  ;;  %v1024_v27 = vld [vmem:[%s1261_s0 + $0x1c] ss:$12 sps:$4 sm:$0xff]   ;;  %v1030_v29 = vld [vmem:[%s1261_s0 + $0x38] ss:$12 sps:$4 sm:$0xff]   ;;  %v1027_v31 = vld [vmem:[%s1261_s0 + $0x34] ss:$12 sps:$4 sm:$0xff]  }
   0xc   :  { %889 = vmatprep.subr.bf16.mxu0 %v1004_v9  ;;  %979 = vmatprep.mubr.bf16.mxu1 %v1022_v24  ;;  %v1026_v30 = vld [vmem:[%s1261_s0 + $0x18] ss:$12 sps:$4 sm:$0xff]   ;;  %v1031_v32 = vld [vmem:[%s1261_s0 + $0x50] ss:$12 sps:$4 sm:$0xff]   ;;  %v1038_v33 = vld [vmem:[%s1261_s0 + $0x68] ss:$12 sps:$4 sm:$0xff]  }
   0xd   :  { %968 = vmatpush3.bf16.msra.mxu1 %v1003_v8  ;;  %v1029_v34 = vld [vmem:[%s1261_s0 + $0x30] ss:$12 sps:$4 sm:$0xff]   ;;  %v1046_v37 = vld [vmem:[%s1261_s0 + $0x98] ss:$12 sps:$4 sm:$0xff]   ;;  %v1034_v38 = vld [vmem:[%s1261_s0 + $0x48] ss:$12 sps:$4 sm:$0xff]  }
   0xe   :  { %969 = vmatprep.subr.bf16.mxu1 %v1006_v11  ;;  %v1035_v39 = vld [vmem:[%s1261_s0 + $0x64] ss:$12 sps:$4 sm:$0xff]   ;;  %v1037_v41 = vld [vmem:[%s1261_s0 + $0x60] ss:$12 sps:$4 sm:$0xff]   ;;  %v1040_v42 = vld [vmem:[%s1261_s0 + $0x7c] ss:$12 sps:$4 sm:$0xff]  }
   0xf   :  { %890 = vmatpush3.bf16.msra.mxu0 %v1005_v10  ;;  %v1047_v40 = vld [vmem:[%s1261_s0 + $0xb0] ss:$12 sps:$4 sm:$0xff]   ;;  %v1042_v43 = vld [vmem:[%s1261_s0 + $0x78] ss:$12 sps:$4 sm:$0xff]   ;;  %v1043_v44 = vld [vmem:[%s1261_s0 + $0x94] ss:$12 sps:$4 sm:$0xff]  }
  0x10   :  { %891 = vmatprep.subr.bf16.mxu0 %v1007_v12  ;;  %v1045_v45 = vld [vmem:[%s1261_s0 + $0x90] ss:$12 sps:$4 sm:$0xff]   ;;  %v1048_v46 = vld [vmem:[%s1261_s0 + $0xac] ss:$12 sps:$4 sm:$0xff]   ;;  %v1050_v47 = vld [vmem:[%s1261_s0 + $0xa8] ss:$12 sps:$4 sm:$0xff]  }
  0x11   :  { %970 = vmatpush3.bf16.msra.mxu1 %v1006_v11  ;;  %v1218_v58 = vld [vmem:[%s1262_s2] ss:$0 sm:$0xff] }
  0x12   :  { %971 = vmatprep.subr.bf16.mxu1 %v1009_v13 }
  0x13   :  { %892 = vmatpush3.bf16.msra.mxu0 %v1008_v14 }
  0x14   :  { %893 = vmatprep.subr.bf16.mxu0 %v1010_v15 }
  0x15   :  { %972 = vmatpush3.bf16.msra.mxu1 %v1009_v13 }
  0x16   :  { %973 = vmatprep.subr.bf16.mxu1 %v1012_v16 }
  0x17   :  { %894 = vmatpush3.bf16.msra.mxu0 %v1011_v17 }
  0x18   :  { %895 = vmatprep.subr.bf16.mxu0 %v1013_v18 }
  0x19   :  { %974 = vmatpush3.bf16.msra.mxu1 %v1012_v16 }
  0x1a   :  { %975 = vmatprep.subr.bf16.mxu1 %v1015_v20 }
  0x1b   :  { %896 = vmatpush3.bf16.msra.mxu0 %v1014_v19 }
  0x1c   :  { %897 = vmatprep.subr.bf16.mxu0 %v1016_v21 }
  0x1d   :  { %976 = vmatpush3.bf16.msra.mxu1 %v1015_v20 }
  0x1e   :  { %977 = vmatprep.subr.bf16.mxu1 %v1018_v22 }
  0x1f   :  { %898 = vmatpush3.bf16.msra.mxu0 %v1017_v25 }
  0x21   :  { %978 = vmatpush3.bf16.msra.mxu1 %v1018_v22 }
  0x22   :  { %436 = vmatmul.mubr.bf16.vlgmr.msra.gmra.mrb[0].mxu0 %v1019_v26 }
  0x23   :  { %443 = vmatprep.mubr.bf16.mxu0 %v1024_v27 }
  0x24   :  { %980 = vmatmul.mubr.bf16.vlgmr.msra.gmra.mrb[0].mxu1 %v1023_v28 }
  0x25   :  { %983 = vmatprep.mubr.bf16.mxu1 %v1030_v29 }
  0x2a   :  { %444 = vmatmul.mubr.bf16.gmra.mrb[4].mxu0 %v1026_v30 }
  0x2b   :  { %451 = vmatprep.mubr.bf16.mxu0 %v1027_v31 }
  0x2c   :  { %984 = vmatmul.mubr.bf16.gmra.mrb[4].mxu1 %v1031_v32 }
  0x2d   :  { %987 = vmatprep.mubr.bf16.mxu1 %v1038_v33 }
  0x32   :  { %452 = vmatmul.mubr.bf16.gmra.mrb[8].mxu0 %v1029_v34 }
  0x33   :  { %459 = vmatprep.mubr.bf16.mxu0 %v1032_v35 }
  0x34   :  { %988 = vmatmul.mubr.bf16.gmra.mrb[8].mxu1 %v1039_v36 }
  0x35   :  { %991 = vmatprep.mubr.bf16.mxu1 %v1046_v37 }
  0x3a   :  { %460 = vmatmul.mubr.bf16.gmra.mrb[12].mxu0 %v1034_v38 }
  0x3b   :  { %467 = vmatprep.mubr.bf16.mxu0 %v1035_v39 }
  0x3c   :  { %992 = vmatmul.mubr.bf16.gmra.mrb[12].mxu1 %v1047_v40 }
  0x42   :  { %468 = vmatmul.mubr.bf16.gmra.mrb[16].mxu0 %v1037_v41 }
  0x43   :  { %475 = vmatprep.mubr.bf16.mxu0 %v1040_v42 }
  0x4a   :  { %476 = vmatmul.mubr.bf16.gmra.mrb[20].mxu0 %v1042_v43 }
  0x4b   :  { %483 = vmatprep.mubr.bf16.mxu0 %v1043_v44 }
  0x52   :  { %484 = vmatmul.mubr.bf16.gmra.mrb[24].mxu0 %v1045_v45 }
  0x53   :  { %491 = vmatprep.mubr.bf16.mxu0 %v1048_v46 }
  0x5a   :  { %492 = vmatmul.mubr.bf16.gmra.mrb[28].mxu0 %v1050_v47 }
  0xf5   :  { %v899_v48 = vpop.f32.mrb[0].mxu0 }
  0xf6   :  { %v900_v49 = vpop.f32.mrb[1].mxu0 }
  0xf7   :  { %v901_v50 = vadd.f32 %v900_v49, %v899_v48  ;;  %v902_v51 = vpop.f32.mrb[2].mxu0  ;;  %v981_v52 = vpop.f32.mrb[0].mxu1 }
  0xf8   :  { %v903_v53 = vpop.f32.mrb[3].mxu0  ;;  %v534_v54 = vpop.f32.mrb[1].mxu1 }
  0xf9   :  { %v904_v55 = vadd.f32 %v903_v53, %v902_v51  ;;  %v535_v56 = vadd.f32 %v901_v50, %v534_v54  ;;  %v982_v57 = vpop.f32.mrb[2].mxu1 }
  0xfa   :  { %v537_v59 = vpop.f32.mrb[3].mxu1 }
  0xfb   :  { %v538_v60 = vadd.f32 %v904_v55, %v537_v59  ;;  %v655_v61 = vadd.f32 %v1218_v58, %v535_v56 }
  0xfd   :  { %v656_v62 = vadd.f32 %v1218_v58, %v538_v60  ;;  %v905_v63 = vpop.f32.mrb[4].mxu0 }
  0xfe   :  { %v906_v0 = vpop.f32.mrb[5].mxu0 }
  0xff   :  { %v839_v1 = vpack.c.bf16 %v656_v62, %v655_v61  ;;  %v907_v2 = vadd.f32 %v906_v0, %v905_v63  ;;  %v908_v3 = vpop.f32.mrb[6].mxu0  ;;  %v985_v4 = vpop.f32.mrb[4].mxu1 }
 0x100   :  { %v909_v5 = vpop.f32.mrb[7].mxu0  ;;  %v550_v6 = vpop.f32.mrb[5].mxu1 }
 0x101   :  { %840 = vst [vmem:[%s1263_s3] sm:$0xff] %v839_v1   ;;  %v543_v7 = vadd.f32 %v981_v52, %v907_v2  ;;  %v910_v8 = vadd.f32 %v909_v5, %v908_v3  ;;  %v986_v9 = vpop.f32.mrb[6].mxu1 }
 0x102   :  { %v553_v10 = vpop.f32.mrb[7].mxu1 }
 0x103   :  { %v546_v11 = vadd.f32 %v982_v57, %v910_v8  ;;  %v657_v12 = vadd.f32 %v1218_v58, %v543_v7 }
 0x105   :  { %v658_v13 = vadd.f32 %v1218_v58, %v546_v11  ;;  %v911_v14 = vpop.f32.mrb[8].mxu0 }
 0x106   :  { %v912_v15 = vpop.f32.mrb[9].mxu0 }
 0x107   :  { %v844_v16 = vpack.c.bf16 %v658_v13, %v657_v12  ;;  %v913_v17 = vadd.f32 %v912_v15, %v911_v14  ;;  %v914_v18 = vpop.f32.mrb[10].mxu0  ;;  %v989_v19 = vpop.f32.mrb[8].mxu1 }
 0x108   :  { %v915_v20 = vpop.f32.mrb[11].mxu0  ;;  %v566_v21 = vpop.f32.mrb[9].mxu1 }
 0x109   :  { %876 = vst [vmem:[%s1263_s3 + $0x8] sm:$0xff] %v844_v16   ;;  %v916_v22 = vadd.f32 %v915_v20, %v914_v18  ;;  %v551_v23 = vadd.f32 %v913_v17, %v550_v6  ;;  %v990_v24 = vpop.f32.mrb[10].mxu1 }
 0x10a   :  { %v569_v25 = vpop.f32.mrb[11].mxu1 }
 0x10b   :  { %v554_v26 = vadd.f32 %v916_v22, %v553_v10  ;;  %v659_v27 = vadd.f32 %v1218_v58, %v551_v23 }
 0x10d   :  { %v660_v28 = vadd.f32 %v1218_v58, %v554_v26  ;;  %v917_v29 = vpop.f32.mrb[12].mxu0 }
 0x10e   :  { %v918_v30 = vpop.f32.mrb[13].mxu0 }
 0x10f   :  { %v849_v31 = vpack.c.bf16 %v660_v28, %v659_v27  ;;  %v919_v32 = vadd.f32 %v918_v30, %v917_v29  ;;  %v920_v33 = vpop.f32.mrb[14].mxu0  ;;  %v993_v34 = vpop.f32.mrb[12].mxu1 }
 0x110   :  { %v921_v35 = vpop.f32.mrb[15].mxu0  ;;  %v582_v36 = vpop.f32.mrb[13].mxu1 }
 0x111   :  { %877 = vst [vmem:[%s1263_s3 + $0x10] sm:$0xff] %v849_v31   ;;  %v559_v37 = vadd.f32 %v985_v4, %v919_v32  ;;  %v922_v38 = vadd.f32 %v921_v35, %v920_v33  ;;  %v994_v39 = vpop.f32.mrb[14].mxu1 }
 0x112   :  { %v585_v40 = vpop.f32.mrb[15].mxu1 }
 0x113   :  { %v562_v41 = vadd.f32 %v986_v9, %v922_v38  ;;  %v661_v42 = vadd.f32 %v1218_v58, %v559_v37 }
 0x115   :  { %v662_v43 = vadd.f32 %v1218_v58, %v562_v41  ;;  %v923_v44 = vpop.f32.mrb[16].mxu0 }
 0x116   :  { %v924_v45 = vpop.f32.mrb[17].mxu0 }
 0x117   :  { %v854_v46 = vpack.c.bf16 %v662_v43, %v661_v42  ;;  %v925_v47 = vadd.f32 %v924_v45, %v923_v44  ;;  %v926_v48 = vpop.f32.mrb[18].mxu0 }
 0x118   :  { %v927_v49 = vpop.f32.mrb[19].mxu0 }
 0x119   :  { %878 = vst [vmem:[%s1263_s3 + $0x18] sm:$0xff] %v854_v46   ;;  %v928_v50 = vadd.f32 %v927_v49, %v926_v48  ;;  %v567_v51 = vadd.f32 %v925_v47, %v566_v21 }
 0x11b   :  { %v570_v52 = vadd.f32 %v928_v50, %v569_v25  ;;  %v663_v53 = vadd.f32 %v1218_v58, %v567_v51 }
 0x11d   :  { %v664_v54 = vadd.f32 %v1218_v58, %v570_v52  ;;  %v929_v55 = vpop.f32.mrb[20].mxu0 }
 0x11e   :  { %v930_v56 = vpop.f32.mrb[21].mxu0 }
 0x11f   :  { %v859_v57 = vpack.c.bf16 %v664_v54, %v663_v53  ;;  %v931_v59 = vadd.f32 %v930_v56, %v929_v55  ;;  %v932_v60 = vpop.f32.mrb[22].mxu0 }
 0x120   :  { %v933_v61 = vpop.f32.mrb[23].mxu0 }
 0x121   :  { %879 = vst [vmem:[%s1263_s3 + $0x20] sm:$0xff] %v859_v57   ;;  %v575_v62 = vadd.f32 %v989_v19, %v931_v59  ;;  %v934_v63 = vadd.f32 %v933_v61, %v932_v60 }
 0x123   :  { %v578_v0 = vadd.f32 %v990_v24, %v934_v63  ;;  %v665_v1 = vadd.f32 %v1218_v58, %v575_v62 }
 0x125   :  { %v666_v2 = vadd.f32 %v1218_v58, %v578_v0  ;;  %v935_v3 = vpop.f32.mrb[24].mxu0 }
 0x126   :  { %v936_v4 = vpop.f32.mrb[25].mxu0 }
 0x127   :  { %v864_v5 = vpack.c.bf16 %v666_v2, %v665_v1  ;;  %v937_v6 = vadd.f32 %v936_v4, %v935_v3  ;;  %v938_v7 = vpop.f32.mrb[26].mxu0 }
 0x128   :  { %v939_v8 = vpop.f32.mrb[27].mxu0 }
 0x129   :  { %880 = vst [vmem:[%s1263_s3 + $0x28] sm:$0xff] %v864_v5   ;;  %v940_v9 = vadd.f32 %v939_v8, %v938_v7  ;;  %v583_v10 = vadd.f32 %v937_v6, %v582_v36 }
 0x12b   :  { %v586_v11 = vadd.f32 %v940_v9, %v585_v40  ;;  %v667_v12 = vadd.f32 %v1218_v58, %v583_v10 }
 0x12d   :  { %v668_v13 = vadd.f32 %v1218_v58, %v586_v11  ;;  %v941_v14 = vpop.f32.mrb[28].mxu0 }
 0x12e   :  { %v942_v15 = vpop.f32.mrb[29].mxu0 }
 0x12f   :  { %v869_v16 = vpack.c.bf16 %v668_v13, %v667_v12  ;;  %v943_v17 = vadd.f32 %v942_v15, %v941_v14  ;;  %v944_v18 = vpop.f32.mrb[30].mxu0 }
 0x130   :  { %v945_v19 = vpop.f32.mrb[31].mxu0 }
 0x131   :  { %881 = vst [vmem:[%s1263_s3 + $0x30] sm:$0xff] %v869_v16   ;;  %v591_v20 = vadd.f32 %v993_v34, %v943_v17  ;;  %v946_v21 = vadd.f32 %v945_v19, %v944_v18 }
 0x133   :  { %v594_v22 = vadd.f32 %v994_v39, %v946_v21  ;;  %v669_v23 = vadd.f32 %v1218_v58, %v591_v20 }
 0x135   :  { %v670_v24 = vadd.f32 %v1218_v58, %v594_v22 }
 0x137   :  { %v874_v25 = vpack.c.bf16 %v670_v24, %v669_v23 }
 0x139   :  { %882 = vst [vmem:[%s1263_s3 + $0x38] sm:$0xff] %v874_v25  }

// kernel: discriminator_forward.9
= control target key start
LH: loop header
LB: loop body
LE: loop exit
PB: predicated region body
PF: predicated region fallthrough
CT: control target
= control target key end

     0   :  { %s1341_s1 = inlined_call_operand.vmem [shape: bf16[512,128], index: 1, kind: input, shape index: {}]   ;;  %s1342_s0 = inlined_call_operand.vmem [shape: bf16[128,512], index: 0, kind: input, shape index: {}]   ;;  %s1343_s2 = inlined_call_operand.vmem [shape: f32[1,128], index: 2, kind: input, shape index: {}]   ;;  %s1344_s3 = inlined_call_operand.vmem [shape: f32[128,128], index: 3, kind: output, shape index: {}]  }
   0x1   :  { %v980_v0 = vld [vmem:[%s1341_s1 + $0x40] sm:$0xff]   ;;  %v984_v4 = vld [vmem:[%s1341_s1 + $0x48] sm:$0xff]   ;;  %v988_v8 = vld [vmem:[%s1341_s1 + $0x50] sm:$0xff]  }
   0x2   :  { %v981_v1 = vld [vmem:[%s1341_s1 + $0xc0] sm:$0xff]   ;;  %852 = vmatprep.subr.bf16.mxu0 %v980_v0  ;;  %v985_v5 = vld [vmem:[%s1341_s1 + $0xc8] sm:$0xff]   ;;  %v989_v9 = vld [vmem:[%s1341_s1 + $0xd0] sm:$0xff]  }
   0x3   :  { %v982_v2 = vld [vmem:[%s1341_s1] sm:$0xff]   ;;  %916 = vmatprep.subr.bf16.mxu1 %v981_v1  ;;  %v986_v6 = vld [vmem:[%s1341_s1 + $0x8] sm:$0xff]   ;;  %v990_v10 = vld [vmem:[%s1341_s1 + $0x10] sm:$0xff]  }
   0x4   :  { %v983_v3 = vld [vmem:[%s1341_s1 + $0x80] sm:$0xff]   ;;  %853 = vmatpush3.bf16.msra.mxu0 %v982_v2  ;;  %v987_v7 = vld [vmem:[%s1341_s1 + $0x88] sm:$0xff]   ;;  %v991_v11 = vld [vmem:[%s1341_s1 + $0x90] sm:$0xff]  }
   0x5   :  { %917 = vmatpush3.bf16.msra.mxu1 %v983_v3  ;;  %854 = vmatprep.subr.bf16.mxu0 %v984_v4  ;;  %v992_v12 = vld [vmem:[%s1341_s1 + $0x58] sm:$0xff]   ;;  %v996_v16 = vld [vmem:[%s1341_s1 + $0x60] sm:$0xff]   ;;  %v1000_v20 = vld [vmem:[%s1341_s1 + $0x68] sm:$0xff]  }
   0x6   :  { %918 = vmatprep.subr.bf16.mxu1 %v985_v5  ;;  %v993_v13 = vld [vmem:[%s1341_s1 + $0xd8] sm:$0xff]   ;;  %v997_v17 = vld [vmem:[%s1341_s1 + $0xe0] sm:$0xff]   ;;  %v1001_v21 = vld [vmem:[%s1341_s1 + $0xe8] sm:$0xff]  }
   0x7   :  { %v994_v14 = vld [vmem:[%s1341_s1 + $0x18] sm:$0xff]   ;;  %v998_v18 = vld [vmem:[%s1341_s1 + $0x20] sm:$0xff]   ;;  %v1002_v22 = vld [vmem:[%s1341_s1 + $0x28] sm:$0xff]  }
   0x8   :  { %855 = vmatpush3.bf16.msra.mxu0 %v986_v6  ;;  %v995_v15 = vld [vmem:[%s1341_s1 + $0x98] sm:$0xff]   ;;  %v999_v19 = vld [vmem:[%s1341_s1 + $0xa0] sm:$0xff]   ;;  %v1003_v23 = vld [vmem:[%s1341_s1 + $0xa8] sm:$0xff]  }
   0x9   :  { %919 = vmatpush3.bf16.msra.mxu1 %v987_v7  ;;  %856 = vmatprep.subr.bf16.mxu0 %v988_v8  ;;  %v1004_v24 = vld [vmem:[%s1341_s1 + $0x70] sm:$0xff]   ;;  %v1008_v28 = vld [vmem:[%s1341_s1 + $0x78] sm:$0xff]  }
   0xa   :  { %920 = vmatprep.subr.bf16.mxu1 %v989_v9  ;;  %v1005_v25 = vld [vmem:[%s1341_s1 + $0xf0] sm:$0xff]   ;;  %v1009_v29 = vld [vmem:[%s1341_s1 + $0xf8] sm:$0xff]   ;;  %v1275_v9 = vld [vmem:[%s1343_s2] ss:$0 sm:$0xff] }
   0xb   :  { %v1006_v26 = vld [vmem:[%s1341_s1 + $0x30] sm:$0xff]   ;;  %v1010_v30 = vld [vmem:[%s1341_s1 + $0x38] sm:$0xff]  }
   0xc   :  { %857 = vmatpush3.bf16.msra.mxu0 %v990_v10  ;;  %v1007_v27 = vld [vmem:[%s1341_s1 + $0xb0] sm:$0xff]   ;;  %v1011_v31 = vld [vmem:[%s1341_s1 + $0xb8] sm:$0xff]  }
   0xd   :  { %921 = vmatpush3.bf16.msra.mxu1 %v991_v11  ;;  %858 = vmatprep.subr.bf16.mxu0 %v992_v12  ;;  %v1012_v32 = vld [vmem:[%s1342_s0] ss:$16 sps:$4 sm:$0xff]   ;;  %v1014_v33 = vld [vmem:[%s1342_s0 + $0x4] ss:$16 sps:$4 sm:$0xff]   ;;  %v1015_v34 = vld [vmem:[%s1342_s0 + $0x8] ss:$16 sps:$4 sm:$0xff]  }
   0xe   :  { %922 = vmatprep.subr.bf16.mxu1 %v993_v13  ;;  %v1017_v35 = vld [vmem:[%s1342_s0 + $0xc] ss:$16 sps:$4 sm:$0xff]   ;;  %531 = vmatprep.mubr.bf16.mxu0 %v1014_v33  ;;  %v1018_v36 = vld [vmem:[%s1342_s0 + $0x24] ss:$16 sps:$4 sm:$0xff]   ;;  %v1022_v38 = vld [vmem:[%s1342_s0 + $0x20] ss:$16 sps:$4 sm:$0xff]  }
   0xf   :  { %628 = vmatprep.mubr.bf16.mxu1 %v1017_v35  ;;  %v1020_v37 = vld [vmem:[%s1342_s0 + $0x2c] ss:$16 sps:$4 sm:$0xff]   ;;  %v1023_v39 = vld [vmem:[%s1342_s0 + $0x28] ss:$16 sps:$4 sm:$0xff]   ;;  %v1024_v40 = vld [vmem:[%s1342_s0 + $0x44] ss:$16 sps:$4 sm:$0xff]  }
  0x10   :  { %859 = vmatpush3.bf16.msra.mxu0 %v994_v14  ;;  %v1026_v41 = vld [vmem:[%s1342_s0 + $0x4c] ss:$16 sps:$4 sm:$0xff]   ;;  %v1028_v42 = vld [vmem:[%s1342_s0 + $0x40] ss:$16 sps:$4 sm:$0xff]   ;;  %v1029_v43 = vld [vmem:[%s1342_s0 + $0x48] ss:$16 sps:$4 sm:$0xff]  }
  0x11   :  { %923 = vmatpush3.bf16.msra.mxu1 %v995_v15  ;;  %860 = vmatprep.subr.bf16.mxu0 %v996_v16  ;;  %v1030_v44 = vld [vmem:[%s1342_s0 + $0x64] ss:$16 sps:$4 sm:$0xff]   ;;  %v1032_v45 = vld [vmem:[%s1342_s0 + $0x6c] ss:$16 sps:$4 sm:$0xff]   ;;  %v1034_v46 = vld [vmem:[%s1342_s0 + $0x60] ss:$16 sps:$4 sm:$0xff]  }
  0x12   :  { %924 = vmatprep.subr.bf16.mxu1 %v997_v17  ;;  %v1035_v47 = vld [vmem:[%s1342_s0 + $0x68] ss:$16 sps:$4 sm:$0xff]   ;;  %v1036_v48 = vld [vmem:[%s1342_s0 + $0x84] ss:$16 sps:$4 sm:$0xff]   ;;  %v1038_v49 = vld [vmem:[%s1342_s0 + $0x8c] ss:$16 sps:$4 sm:$0xff]  }
  0x13   :  { %v1040_v50 = vld [vmem:[%s1342_s0 + $0x80] ss:$16 sps:$4 sm:$0xff]   ;;  %v1041_v51 = vld [vmem:[%s1342_s0 + $0x88] ss:$16 sps:$4 sm:$0xff]   ;;  %v1042_v52 = vld [vmem:[%s1342_s0 + $0xa4] ss:$16 sps:$4 sm:$0xff]  }
  0x14   :  { %861 = vmatpush3.bf16.msra.mxu0 %v998_v18  ;;  %v1044_v53 = vld [vmem:[%s1342_s0 + $0xac] ss:$16 sps:$4 sm:$0xff]   ;;  %v1046_v54 = vld [vmem:[%s1342_s0 + $0xa0] ss:$16 sps:$4 sm:$0xff]   ;;  %v1047_v55 = vld [vmem:[%s1342_s0 + $0xa8] ss:$16 sps:$4 sm:$0xff]  }
  0x15   :  { %925 = vmatpush3.bf16.msra.mxu1 %v999_v19  ;;  %862 = vmatprep.subr.bf16.mxu0 %v1000_v20  ;;  %v1048_v56 = vld [vmem:[%s1342_s0 + $0xc4] ss:$16 sps:$4 sm:$0xff]   ;;  %v1050_v57 = vld [vmem:[%s1342_s0 + $0xcc] ss:$16 sps:$4 sm:$0xff]   ;;  %v1052_v58 = vld [vmem:[%s1342_s0 + $0xc0] ss:$16 sps:$4 sm:$0xff]  }
  0x16   :  { %926 = vmatprep.subr.bf16.mxu1 %v1001_v21  ;;  %v1053_v59 = vld [vmem:[%s1342_s0 + $0xc8] ss:$16 sps:$4 sm:$0xff]   ;;  %v1054_v60 = vld [vmem:[%s1342_s0 + $0xe4] ss:$16 sps:$4 sm:$0xff]   ;;  %v1056_v61 = vld [vmem:[%s1342_s0 + $0xec] ss:$16 sps:$4 sm:$0xff]  }
  0x17   :  { %v1058_v62 = vld [vmem:[%s1342_s0 + $0xe0] ss:$16 sps:$4 sm:$0xff]   ;;  %v1059_v63 = vld [vmem:[%s1342_s0 + $0xe8] ss:$16 sps:$4 sm:$0xff]  }
  0x18   :  { %863 = vmatpush3.bf16.msra.mxu0 %v1002_v22 }
  0x19   :  { %927 = vmatpush3.bf16.msra.mxu1 %v1003_v23  ;;  %864 = vmatprep.subr.bf16.mxu0 %v1004_v24 }
  0x1a   :  { %928 = vmatprep.subr.bf16.mxu1 %v1005_v25 }
  0x1c   :  { %865 = vmatpush3.bf16.msra.mxu0 %v1006_v26 }
  0x1d   :  { %929 = vmatpush3.bf16.msra.mxu1 %v1007_v27  ;;  %866 = vmatprep.subr.bf16.mxu0 %v1008_v28 }
  0x1e   :  { %930 = vmatprep.subr.bf16.mxu1 %v1009_v29 }
  0x20   :  { %867 = vmatpush3.bf16.msra.mxu0 %v1010_v30 }
  0x21   :  { %931 = vmatpush3.bf16.msra.mxu1 %v1011_v31 }
  0x23   :  { %532 = vmatmul.mubr.bf16.vlgmr.msra.gmra.mrb[0].mxu0 %v1012_v32 }
  0x24   :  { %629 = vmatmul.mubr.bf16.vlgmr.msra.gmra.mrb[0].mxu1 %v1015_v34  ;;  %539 = vmatprep.mubr.bf16.mxu0 %v1018_v36 }
  0x25   :  { %636 = vmatprep.mubr.bf16.mxu1 %v1020_v37 }
  0x2b   :  { %540 = vmatmul.mubr.bf16.gmra.mrb[4].mxu0 %v1022_v38 }
  0x2c   :  { %637 = vmatmul.mubr.bf16.gmra.mrb[4].mxu1 %v1023_v39  ;;  %547 = vmatprep.mubr.bf16.mxu0 %v1024_v40 }
  0x2d   :  { %644 = vmatprep.mubr.bf16.mxu1 %v1026_v41 }
  0x33   :  { %548 = vmatmul.mubr.bf16.gmra.mrb[8].mxu0 %v1028_v42 }
  0x34   :  { %645 = vmatmul.mubr.bf16.gmra.mrb[8].mxu1 %v1029_v43  ;;  %555 = vmatprep.mubr.bf16.mxu0 %v1030_v44 }
  0x35   :  { %652 = vmatprep.mubr.bf16.mxu1 %v1032_v45 }
  0x3b   :  { %556 = vmatmul.mubr.bf16.gmra.mrb[12].mxu0 %v1034_v46 }
  0x3c   :  { %653 = vmatmul.mubr.bf16.gmra.mrb[12].mxu1 %v1035_v47  ;;  %563 = vmatprep.mubr.bf16.mxu0 %v1036_v48 }
  0x3d   :  { %660 = vmatprep.mubr.bf16.mxu1 %v1038_v49 }
  0x43   :  { %564 = vmatmul.mubr.bf16.gmra.mrb[16].mxu0 %v1040_v50 }
  0x44   :  { %661 = vmatmul.mubr.bf16.gmra.mrb[16].mxu1 %v1041_v51  ;;  %571 = vmatprep.mubr.bf16.mxu0 %v1042_v52 }
  0x45   :  { %668 = vmatprep.mubr.bf16.mxu1 %v1044_v53 }
  0x4b   :  { %572 = vmatmul.mubr.bf16.gmra.mrb[20].mxu0 %v1046_v54 }
  0x4c   :  { %669 = vmatmul.mubr.bf16.gmra.mrb[20].mxu1 %v1047_v55  ;;  %579 = vmatprep.mubr.bf16.mxu0 %v1048_v56 }
  0x4d   :  { %676 = vmatprep.mubr.bf16.mxu1 %v1050_v57 }
  0x53   :  { %580 = vmatmul.mubr.bf16.gmra.mrb[24].mxu0 %v1052_v58 }
  0x54   :  { %677 = vmatmul.mubr.bf16.gmra.mrb[24].mxu1 %v1053_v59  ;;  %587 = vmatprep.mubr.bf16.mxu0 %v1054_v60 }
  0x55   :  { %684 = vmatprep.mubr.bf16.mxu1 %v1056_v61 }
  0x5b   :  { %588 = vmatmul.mubr.bf16.gmra.mrb[28].mxu0 %v1058_v62 }
  0x5c   :  { %685 = vmatmul.mubr.bf16.gmra.mrb[28].mxu1 %v1059_v63 }
  0xf6   :  { %v868_v0 = vpop.f32.mrb[0].mxu0 }
  0xf7   :  { %v932_v1 = vpop.f32.mrb[0].mxu1  ;;  %v869_v2 = vpop.f32.mrb[1].mxu0 }
  0xf8   :  { %v870_v3 = vadd.f32 %v869_v2, %v868_v0  ;;  %v933_v4 = vpop.f32.mrb[1].mxu1  ;;  %v871_v5 = vpop.f32.mrb[2].mxu0 }
  0xf9   :  { %v934_v6 = vadd.f32 %v933_v4, %v932_v1  ;;  %v935_v7 = vpop.f32.mrb[2].mxu1  ;;  %v872_v8 = vpop.f32.mrb[3].mxu0 }
  0xfa   :  { %v873_v10 = vadd.f32 %v872_v8, %v871_v5  ;;  %v936_v11 = vpop.f32.mrb[3].mxu1 }
  0xfb   :  { %v631_v12 = vadd.f32 %v934_v6, %v870_v3  ;;  %v937_v13 = vadd.f32 %v936_v11, %v935_v7 }
  0xfd   :  { %v751_v14 = vadd.f32 %v1275_v9, %v631_v12  ;;  %v634_v15 = vadd.f32 %v937_v13, %v873_v10 }
  0xfe   :  { %v874_v16 = vpop.f32.mrb[4].mxu0 }
  0xff   :  { %767 = vst [vmem:[%s1344_s3] sm:$0xff] %v751_v14  ;;  %v752_v17 = vadd.f32 %v1275_v9, %v634_v15  ;;  %v938_v18 = vpop.f32.mrb[4].mxu1  ;;  %v875_v19 = vpop.f32.mrb[5].mxu0 }
 0x100   :  { %v876_v20 = vadd.f32 %v875_v19, %v874_v16  ;;  %v939_v21 = vpop.f32.mrb[5].mxu1  ;;  %v877_v22 = vpop.f32.mrb[6].mxu0 }
 0x101   :  { %768 = vst [vmem:[%s1344_s3 + $0x8] sm:$0xff] %v752_v17  ;;  %v940_v23 = vadd.f32 %v939_v21, %v938_v18  ;;  %v941_v24 = vpop.f32.mrb[6].mxu1  ;;  %v878_v25 = vpop.f32.mrb[7].mxu0 }
 0x102   :  { %v879_v26 = vadd.f32 %v878_v25, %v877_v22  ;;  %v942_v27 = vpop.f32.mrb[7].mxu1 }
 0x103   :  { %v639_v28 = vadd.f32 %v940_v23, %v876_v20  ;;  %v943_v29 = vadd.f32 %v942_v27, %v941_v24 }
 0x105   :  { %v753_v30 = vadd.f32 %v1275_v9, %v639_v28  ;;  %v642_v31 = vadd.f32 %v943_v29, %v879_v26 }
 0x106   :  { %v880_v32 = vpop.f32.mrb[8].mxu0 }
 0x107   :  { %769 = vst [vmem:[%s1344_s3 + $0x10] sm:$0xff] %v753_v30  ;;  %v754_v33 = vadd.f32 %v1275_v9, %v642_v31  ;;  %v944_v34 = vpop.f32.mrb[8].mxu1  ;;  %v881_v35 = vpop.f32.mrb[9].mxu0 }
 0x108   :  { %v882_v36 = vadd.f32 %v881_v35, %v880_v32  ;;  %v945_v37 = vpop.f32.mrb[9].mxu1  ;;  %v883_v38 = vpop.f32.mrb[10].mxu0 }
 0x109   :  { %770 = vst [vmem:[%s1344_s3 + $0x18] sm:$0xff] %v754_v33  ;;  %v946_v39 = vadd.f32 %v945_v37, %v944_v34  ;;  %v947_v40 = vpop.f32.mrb[10].mxu1  ;;  %v884_v41 = vpop.f32.mrb[11].mxu0 }
 0x10a   :  { %v885_v42 = vadd.f32 %v884_v41, %v883_v38  ;;  %v948_v43 = vpop.f32.mrb[11].mxu1 }
 0x10b   :  { %v647_v44 = vadd.f32 %v946_v39, %v882_v36  ;;  %v949_v45 = vadd.f32 %v948_v43, %v947_v40 }
 0x10d   :  { %v755_v46 = vadd.f32 %v1275_v9, %v647_v44  ;;  %v650_v47 = vadd.f32 %v949_v45, %v885_v42 }
 0x10e   :  { %v886_v48 = vpop.f32.mrb[12].mxu0 }
 0x10f   :  { %771 = vst [vmem:[%s1344_s3 + $0x20] sm:$0xff] %v755_v46  ;;  %v756_v49 = vadd.f32 %v1275_v9, %v650_v47  ;;  %v950_v50 = vpop.f32.mrb[12].mxu1  ;;  %v887_v51 = vpop.f32.mrb[13].mxu0 }
 0x110   :  { %v888_v52 = vadd.f32 %v887_v51, %v886_v48  ;;  %v951_v53 = vpop.f32.mrb[13].mxu1  ;;  %v889_v54 = vpop.f32.mrb[14].mxu0 }
 0x111   :  { %772 = vst [vmem:[%s1344_s3 + $0x28] sm:$0xff] %v756_v49  ;;  %v952_v55 = vadd.f32 %v951_v53, %v950_v50  ;;  %v953_v56 = vpop.f32.mrb[14].mxu1  ;;  %v890_v57 = vpop.f32.mrb[15].mxu0 }
 0x112   :  { %v891_v58 = vadd.f32 %v890_v57, %v889_v54  ;;  %v954_v59 = vpop.f32.mrb[15].mxu1 }
 0x113   :  { %v655_v60 = vadd.f32 %v952_v55, %v888_v52  ;;  %v955_v61 = vadd.f32 %v954_v59, %v953_v56 }
 0x115   :  { %v757_v62 = vadd.f32 %v1275_v9, %v655_v60  ;;  %v658_v63 = vadd.f32 %v955_v61, %v891_v58 }
 0x116   :  { %v892_v0 = vpop.f32.mrb[16].mxu0 }
 0x117   :  { %773 = vst [vmem:[%s1344_s3 + $0x30] sm:$0xff] %v757_v62  ;;  %v758_v1 = vadd.f32 %v1275_v9, %v658_v63  ;;  %v956_v2 = vpop.f32.mrb[16].mxu1  ;;  %v893_v3 = vpop.f32.mrb[17].mxu0 }
 0x118   :  { %v894_v4 = vadd.f32 %v893_v3, %v892_v0  ;;  %v957_v5 = vpop.f32.mrb[17].mxu1  ;;  %v895_v6 = vpop.f32.mrb[18].mxu0 }
 0x119   :  { %774 = vst [vmem:[%s1344_s3 + $0x38] sm:$0xff] %v758_v1  ;;  %v958_v7 = vadd.f32 %v957_v5, %v956_v2  ;;  %v959_v8 = vpop.f32.mrb[18].mxu1  ;;  %v896_v10 = vpop.f32.mrb[19].mxu0 }
 0x11a   :  { %v897_v11 = vadd.f32 %v896_v10, %v895_v6  ;;  %v960_v12 = vpop.f32.mrb[19].mxu1 }
 0x11b   :  { %v663_v13 = vadd.f32 %v958_v7, %v894_v4  ;;  %v961_v14 = vadd.f32 %v960_v12, %v959_v8 }
 0x11d   :  { %v759_v15 = vadd.f32 %v1275_v9, %v663_v13  ;;  %v666_v16 = vadd.f32 %v961_v14, %v897_v11 }
 0x11e   :  { %v898_v17 = vpop.f32.mrb[20].mxu0 }
 0x11f   :  { %775 = vst [vmem:[%s1344_s3 + $0x40] sm:$0xff] %v759_v15  ;;  %v760_v18 = vadd.f32 %v1275_v9, %v666_v16  ;;  %v962_v19 = vpop.f32.mrb[20].mxu1  ;;  %v899_v20 = vpop.f32.mrb[21].mxu0 }
 0x120   :  { %v900_v21 = vadd.f32 %v899_v20, %v898_v17  ;;  %v963_v22 = vpop.f32.mrb[21].mxu1  ;;  %v901_v23 = vpop.f32.mrb[22].mxu0 }
 0x121   :  { %776 = vst [vmem:[%s1344_s3 + $0x48] sm:$0xff] %v760_v18  ;;  %v964_v24 = vadd.f32 %v963_v22, %v962_v19  ;;  %v965_v25 = vpop.f32.mrb[22].mxu1  ;;  %v902_v26 = vpop.f32.mrb[23].mxu0 }
 0x122   :  { %v903_v27 = vadd.f32 %v902_v26, %v901_v23  ;;  %v966_v28 = vpop.f32.mrb[23].mxu1 }
 0x123   :  { %v671_v29 = vadd.f32 %v964_v24, %v900_v21  ;;  %v967_v30 = vadd.f32 %v966_v28, %v965_v25 }
 0x125   :  { %v761_v31 = vadd.f32 %v1275_v9, %v671_v29  ;;  %v674_v32 = vadd.f32 %v967_v30, %v903_v27 }
 0x126   :  { %v904_v33 = vpop.f32.mrb[24].mxu0 }
 0x127   :  { %777 = vst [vmem:[%s1344_s3 + $0x50] sm:$0xff] %v761_v31  ;;  %v762_v34 = vadd.f32 %v1275_v9, %v674_v32  ;;  %v968_v35 = vpop.f32.mrb[24].mxu1  ;;  %v905_v36 = vpop.f32.mrb[25].mxu0 }
 0x128   :  { %v906_v37 = vadd.f32 %v905_v36, %v904_v33  ;;  %v969_v38 = vpop.f32.mrb[25].mxu1  ;;  %v907_v39 = vpop.f32.mrb[26].mxu0 }
 0x129   :  { %778 = vst [vmem:[%s1344_s3 + $0x58] sm:$0xff] %v762_v34  ;;  %v970_v40 = vadd.f32 %v969_v38, %v968_v35  ;;  %v971_v41 = vpop.f32.mrb[26].mxu1  ;;  %v908_v42 = vpop.f32.mrb[27].mxu0 }
 0x12a   :  { %v909_v43 = vadd.f32 %v908_v42, %v907_v39  ;;  %v972_v44 = vpop.f32.mrb[27].mxu1 }
 0x12b   :  { %v679_v45 = vadd.f32 %v970_v40, %v906_v37  ;;  %v973_v46 = vadd.f32 %v972_v44, %v971_v41 }
 0x12d   :  { %v763_v47 = vadd.f32 %v1275_v9, %v679_v45  ;;  %v682_v48 = vadd.f32 %v973_v46, %v909_v43 }
 0x12e   :  { %v910_v49 = vpop.f32.mrb[28].mxu0 }
 0x12f   :  { %779 = vst [vmem:[%s1344_s3 + $0x60] sm:$0xff] %v763_v47  ;;  %v764_v50 = vadd.f32 %v1275_v9, %v682_v48  ;;  %v974_v51 = vpop.f32.mrb[28].mxu1  ;;  %v911_v52 = vpop.f32.mrb[29].mxu0 }
 0x130   :  { %v912_v53 = vadd.f32 %v911_v52, %v910_v49  ;;  %v975_v54 = vpop.f32.mrb[29].mxu1  ;;  %v913_v55 = vpop.f32.mrb[30].mxu0 }
 0x131   :  { %780 = vst [vmem:[%s1344_s3 + $0x68] sm:$0xff] %v764_v50  ;;  %v976_v56 = vadd.f32 %v975_v54, %v974_v51  ;;  %v977_v57 = vpop.f32.mrb[30].mxu1  ;;  %v914_v58 = vpop.f32.mrb[31].mxu0 }
 0x132   :  { %v915_v59 = vadd.f32 %v914_v58, %v913_v55  ;;  %v978_v60 = vpop.f32.mrb[31].mxu1 }
 0x133   :  { %v687_v61 = vadd.f32 %v976_v56, %v912_v53  ;;  %v979_v62 = vadd.f32 %v978_v60, %v977_v57 }
 0x135   :  { %v765_v63 = vadd.f32 %v1275_v9, %v687_v61  ;;  %v690_v0 = vadd.f32 %v979_v62, %v915_v59 }
 0x137   :  { %781 = vst [vmem:[%s1344_s3 + $0x70] sm:$0xff] %v765_v63  ;;  %v766_v1 = vadd.f32 %v1275_v9, %v690_v0 }
 0x139   :  { %782 = vst [vmem:[%s1344_s3 + $0x78] sm:$0xff] %v766_v1 }

</bundles_post_ra>
